<compile_context>
chip_gen: v7x
topology: tpu7x:2x2x1
jax: 0.10.0
libtpu: 0.0.40
codegen_flags: <defaults>
</compile_context>

<pallas_src>
import jax
import jax.numpy as jnp
import numpy as np
from jax import lax
from jax.experimental import pallas as pl
from jax.experimental.pallas import tpu as pltpu


# ----------------------------- Pallas kernel --------------------------------
def bigru_kernel(x_ref, wih_ref, bih_ref, whh_ref, bhhn_ref, wfc_ref, bfc_ref,
                 out_ref, gi_ref):
    """Fused bidirectional GRU for one batch block.

    x_ref   : (T*BB, E)   rows time-major: row t*BB + j = x_j(t)
    wih_ref : (E, 6H)     [Wih_f || Wih_b], gate-major cols [rf|rb|zf|zb|nf|nb]
    bih_ref : (1, 6H)     bih (+ bhh folded in for the r and z gates)
    whh_ref : (2H, 6H)    block-diagonal, gate-major columns
    bhhn_ref: (1, 2H)     n-gate hidden bias [bhn_f | bhn_b]
    wfc_ref : (2H, Op), bfc_ref : (1, Op)   (Op = O padded to 128 lanes)
    out_ref : (BB, Op)
    gi_ref  : (T*BB, 6H)  VMEM scratch: hoisted input projection
    """
    BB = out_ref.shape[0]
    H2 = whh_ref.shape[0]          # 2H (both directions, per gate)
    H = H2 // 2
    G = 3 * H2                     # 6H
    T = x_ref.shape[0] // BB

    # Hoisted input projection: one MXU matmul for all timesteps and both
    # directions.  bih already contains the r/z parts of bhh.
    gi_ref[...] = (jnp.dot(x_ref[...], wih_ref[...],
                           preferred_element_type=jnp.float32) + bih_ref[...])

    # Lane mask picking the forward-direction half (first H lanes) of each
    # 2H-wide gate slab.  Built once, outside the serial loop, from compares
    # only (no vector div/mod).
    col = lax.broadcasted_iota(jnp.int32, (1, G), 1)
    fwd_cols = col < H
    for g in (1, 2):
        fwd_cols = fwd_cols | ((col >= g * H2) & (col < g * H2 + H))

    def step(t, h):
        # h: (BB, 2H) = [hf | hb]
        rf = pl.multiple_of(t * BB, 8)                 # forward gates: x(t)
        rb = pl.multiple_of((T - 1 - t) * BB, 8)       # backward gates: x(T-1-t)
        gi_f = gi_ref[pl.ds(rf, BB), :]                # (BB, 6H)
        gi_b = gi_ref[pl.ds(rb, BB), :]                # (BB, 6H)
        gi = jnp.where(fwd_cols, gi_f, gi_b)           # one vsel

        gh = jnp.dot(h, whh_ref[...],
                     preferred_element_type=jnp.float32)  # (BB, 6H), no bias

        # PyTorch GRU cell, both directions fused (gate-major 2H-wide slabs):
        #   r = sigmoid(Wir x + bir + Whr h + bhr)   (bhr folded into gi)
        #   z = sigmoid(Wiz x + biz + Whz h + bhz)   (bhz folded into gi)
        #   n = tanh  (Win x + bin + r * (Whn h + bhn))
        #   h' = n + z * (h - n)
        rz = jax.nn.sigmoid(gi[:, :2 * H2] + gh[:, :2 * H2])   # one 128-lane EUP slab
        r = rz[:, :H2]
        z = rz[:, H2:]
        n = jnp.tanh(gi[:, 2 * H2:] + r * (gh[:, 2 * H2:] + bhhn_ref[...]))
        return n + z * (h - n)

    h0 = jnp.zeros((BB, H2), jnp.float32)
    # Full unroll only for small T; bounded unroll keeps vreg pressure sane.
    h = lax.fori_loop(0, T, step, h0, unroll=(True if T <= 16 else 8))

    # h is already [hf_final | hb_final]  (== cat(hidden[-2], hidden[-1])).
    out_ref[...] = (jnp.dot(h, wfc_ref[...], preferred_element_type=jnp.float32)
                    + bfc_ref[...])


# ------------------------- fused weight preparation --------------------------
def _gate_major(wf, wb, H):
    """(D,3H)+(D,3H) in [r|z|n] order -> (D,6H), cols [rf|rb|zf|zb|nf|nb]."""
    return jnp.concatenate([wf[:, 0:H], wb[:, 0:H],
                            wf[:, H:2 * H], wb[:, H:2 * H],
                            wf[:, 2 * H:3 * H], wb[:, 2 * H:3 * H]], axis=1)


def _block_diag_gate_major(wf, wb, H):
    """(H,3H)+(H,3H) -> block-diagonal (2H,6H), cols [rf|rb|zf|zb|nf|nb]."""
    zf = jnp.zeros((wf.shape[0], H), wf.dtype)
    zb = jnp.zeros((wb.shape[0], H), wb.dtype)
    top = jnp.concatenate([wf[:, 0:H], zf, wf[:, H:2 * H], zf,
                           wf[:, 2 * H:3 * H], zf], axis=1)
    bot = jnp.concatenate([zb, wb[:, 0:H], zb, wb[:, H:2 * H],
                           zb, wb[:, 2 * H:3 * H]], axis=1)
    return jnp.concatenate([top, bot], axis=0)


def prepare_fused_params(params):
    H = params["whh_f"].shape[0]
    wih = _gate_major(params["wih_f"], params["wih_b"], H)              # (E, 6H)
    whh = _block_diag_gate_major(params["whh_f"], params["whh_b"], H)   # (2H,6H)
    bih = _gate_major(params["bih_f"], params["bih_b"], H)              # (1, 6H)
    bhh = _gate_major(params["bhh_f"], params["bhh_b"], H)              # (1, 6H)
    # Fold the r/z-gate hidden biases into the (hoisted) input bias; only the
    # n-gate hidden bias must stay inside  r * (Whn h + bhn).
    bih = bih.at[:, :4 * H].add(bhh[:, :4 * H])
    bhh_n = bhh[:, 4 * H:]                                              # (1, 2H)
    return {"wih": wih, "whh": whh, "bih": bih, "bhh_n": bhh_n,
            "wfc": params["wfc"], "bfc": params["bfc"]}


# ------------------------------ wrapper --------------------------------------
def bigru_forward(token_ids, params, *, batch_block=8):
    fused = prepare_fused_params(params)

    # Embedding lookup (frozen nn.Embedding) = plain JAX gather in the wrapper.
    emb = jnp.take(params["embedding"], token_ids, axis=0).astype(jnp.float32)  # (B,T,E)
    B, T, E = emb.shape
    H = params["whh_f"].shape[0]
    O = params["wfc"].shape[1]

    BB = batch_block                      # rows per grid step (sublane multiple)
    Bp = -(-B // BB) * BB                 # padded batch
    nb = Bp // BB                         # grid size (>=2 shards v7x megacore)

    # Padded batch rows (B..Bp) compute harmless bias-only values (sigmoid/tanh
    # cannot NaN) and are sliced off below -- do not "optimize" them into
    # masked stores.
    x = jnp.pad(emb, ((0, Bp - B), (0, 0), (0, 0)))        # (Bp, T, E)
    # Arrange so each batch block is contiguous and time-major inside:
    # x[i, t*BB + j, :] = emb_padded[i*BB + j, t, :]
    x = x.reshape(nb, BB, T, E).transpose(0, 2, 1, 3).reshape(nb, T * BB, E)

    # Lane-dense output: pad the fc to 128 lanes (unmasked vst), slice after.
    Op = max(128, -(-O // 128) * 128)
    wfc = jnp.pad(fused["wfc"], ((0, 0), (0, Op - O)))
    bfc = jnp.pad(fused["bfc"], ((0, 0), (0, Op - O)))

    # TODO(synk): for production T/H, chunk the hoisted projection over T
    # (carry h across chunks) and set vmem_limit_bytes explicitly for v7x's
    # 64 MiB VMEM; not needed at these toy shapes (gi is T*BB*6H*4 = 48 KiB).
    out = pl.pallas_call(
        bigru_kernel,
        out_shape=jax.ShapeDtypeStruct((Bp, Op), jnp.float32),
        grid=(nb,),
        in_specs=[
            pl.BlockSpec((None, T * BB, E), lambda b: (b, 0, 0)),   # x (per block)
            pl.BlockSpec((E, 6 * H), lambda b: (0, 0)),             # wih
            pl.BlockSpec((1, 6 * H), lambda b: (0, 0)),             # bih (fused)
            pl.BlockSpec((2 * H, 6 * H), lambda b: (0, 0)),         # whh
            pl.BlockSpec((1, 2 * H), lambda b: (0, 0)),             # bhh_n
            pl.BlockSpec((2 * H, Op), lambda b: (0, 0)),            # wfc (padded)
            pl.BlockSpec((1, Op), lambda b: (0, 0)),                # bfc (padded)
        ],
        out_specs=pl.BlockSpec((BB, Op), lambda b: (b, 0)),
        scratch_shapes=[pltpu.VMEM((T * BB, 6 * H), jnp.float32)],
        compiler_params=pltpu.CompilerParams(
            dimension_semantics=("parallel",)),
    )(x, fused["wih"], fused["bih"], fused["whh"], fused["bhh_n"], wfc, bfc)

    return out[:B, :O]


# --------------------------- pure-JAX reference -------------------------------
def ref_forward(token_ids, params):
    emb = jnp.take(params["embedding"], token_ids, axis=0)  # (B, T, E)
    B, T, _ = emb.shape
    H = params["whh_f"].shape[0]

    def cell(x, h, wih, whh, bih, bhh):
        gi = x @ wih + bih
        gh = h @ whh + bhh
        r = jax.nn.sigmoid(gi[:, 0:H] + gh[:, 0:H])
        z = jax.nn.sigmoid(gi[:, H:2 * H] + gh[:, H:2 * H])
        n = jnp.tanh(gi[:, 2 * H:3 * H] + r * gh[:, 2 * H:3 * H])
        return (1.0 - z) * n + z * h

    hf = jnp.zeros((B, H), jnp.float32)
    hb = jnp.zeros((B, H), jnp.float32)
    for t in range(T):
        hf = cell(emb[:, t], hf, params["wih_f"], params["whh_f"],
                  params["bih_f"], params["bhh_f"])
        hb = cell(emb[:, T - 1 - t], hb, params["wih_b"], params["whh_b"],
                  params["bih_b"], params["bhh_b"])
    # PyTorch: fc(cat(hidden[-2], hidden[-1])) = fc([hf_final | hb_final])
    hcat = jnp.concatenate([hf, hb], axis=1)
    return hcat @ params["wfc"] + params["bfc"]


# ----------------------------- param init ------------------------------------
def init_params(key, vocab, E, H, O):
    ks = jax.random.split(key, 12)
    s = 1.0 / np.sqrt(H)
    u = lambda k, shape: jax.random.uniform(k, shape, jnp.float32, -s, s)
    return {
        "embedding": jax.random.normal(ks[0], (vocab, E), jnp.float32) * 0.1,
        # forward direction (right-multiply layout, PyTorch gate order [r|z|n])
        "wih_f": u(ks[1], (E, 3 * H)),
        "whh_f": u(ks[2], (H, 3 * H)),
        "bih_f": u(ks[3], (1, 3 * H)),
        "bhh_f": u(ks[4], (1, 3 * H)),
        # backward direction
        "wih_b": u(ks[5], (E, 3 * H)),
        "whh_b": u(ks[6], (H, 3 * H)),
        "bih_b": u(ks[7], (1, 3 * H)),
        "bhh_b": u(ks[8], (1, 3 * H)),
        # fc: Linear(2H -> O)
        "wfc": u(ks[9], (2 * H, O)),
        "bfc": u(ks[10], (1, O)),
    }


if __name__ == "__main__":
    vocab, E, H, O = 100, 16, 32, 4
    B, T = 2, 8

    key = jax.random.PRNGKey(0)
    k_params, k_tokens = jax.random.split(key)
    params = init_params(k_params, vocab, E, H, O)
    token_ids = jax.random.randint(k_tokens, (B, T), 0, vocab, dtype=jnp.int32)

    out = bigru_forward(token_ids, params)
    jax.block_until_ready(out)

    ref = ref_forward(token_ids, params)
    assert out.shape == (B, O)
    assert jnp.allclose(out, ref, atol=2e-3, rtol=2e-3), (
        f"max abs diff {jnp.max(jnp.abs(out - ref))}")
    print("KERNEL_OK")
</pallas_src>

<mosaic_0001>
module attributes {stable_mosaic.version = 11 : i64} {
  func.func @bigru_kernel(%arg0: i32, %arg1: memref<1x64x16xf32, #tpu.memory_space<vmem>>, %arg2: memref<16x192xf32, #tpu.memory_space<vmem>>, %arg3: memref<1x192xf32, #tpu.memory_space<vmem>>, %arg4: memref<64x192xf32, #tpu.memory_space<vmem>>, %arg5: memref<1x64xf32, #tpu.memory_space<vmem>>, %arg6: memref<64x128xf32, #tpu.memory_space<vmem>>, %arg7: memref<1x128xf32, #tpu.memory_space<vmem>>, %arg8: memref<8x128xf32, #tpu.memory_space<vmem>>, %arg9: memref<64x192xf32, #tpu.memory_space<vmem>>) attributes {dimension_semantics = [#tpu.dimension_semantics<parallel>], iteration_bounds = array<i64: 1>, scalar_prefetch = 0 : i64, scratch_operands = 1 : i64, tpu.core_type = #tpu.core_type<tc>, window_params = [{transform_indices = @transform_0, window_bounds = array<i64: 1, 64, 16>}, {pipeline_mode = #tpu.pipeline_mode<synchronous>, transform_indices = @transform_1, window_bounds = array<i64: 16, 192>}, {pipeline_mode = #tpu.pipeline_mode<synchronous>, transform_indices = @transform_2, window_bounds = array<i64: 1, 192>}, {pipeline_mode = #tpu.pipeline_mode<synchronous>, transform_indices = @transform_3, window_bounds = array<i64: 64, 192>}, {pipeline_mode = #tpu.pipeline_mode<synchronous>, transform_indices = @transform_4, window_bounds = array<i64: 1, 64>}, {pipeline_mode = #tpu.pipeline_mode<synchronous>, transform_indices = @transform_5, window_bounds = array<i64: 64, 128>}, {pipeline_mode = #tpu.pipeline_mode<synchronous>, transform_indices = @transform_6, window_bounds = array<i64: 1, 128>}, {transform_indices = @transform_7, window_bounds = array<i64: 8, 128>}]} {
    %c0 = arith.constant 0 : index
    %c0_0 = arith.constant 0 : index
    %c0_1 = arith.constant 0 : index
    %0 = vector.load %arg1[%c0, %c0_0, %c0_1] : memref<1x64x16xf32, #tpu.memory_space<vmem>>, vector<1x64x16xf32>
    %1 = vector.shape_cast %0 : vector<1x64x16xf32> to vector<64x16xf32>
    %c0_2 = arith.constant 0 : index
    %c0_3 = arith.constant 0 : index
    %2 = vector.load %arg2[%c0_2, %c0_3] : memref<16x192xf32, #tpu.memory_space<vmem>>, vector<16x192xf32>
    %cst = arith.constant dense<0.000000e+00> : vector<64x192xf32>
    %3 = tpu.matmul %1, %2, %cst {dimension_numbers = #tpu.dot_dimension_numbers<[1], [0], [0], [1], [0, 0, 1, 1], [], []>} : vector<64x16xf32>, vector<16x192xf32>, vector<64x192xf32> -> vector<64x192xf32>
    %c0_4 = arith.constant 0 : index
    %c0_5 = arith.constant 0 : index
    %4 = vector.load %arg3[%c0_4, %c0_5] : memref<1x192xf32, #tpu.memory_space<vmem>>, vector<1x192xf32>
    %5 = vector.broadcast %4 : vector<1x192xf32> to vector<64x192xf32>
    %6 = arith.addf %3, %5 : vector<64x192xf32>
    %c0_6 = arith.constant 0 : index
    %c0_7 = arith.constant 0 : index
    %7 = vector.load %arg9[%c0_6, %c0_7] : memref<64x192xf32, #tpu.memory_space<vmem>>, vector<64x192xf32>
    tpu.vector_store %arg9[%c0_6, %c0_7], %6 {strides = array<i32>} : memref<64x192xf32, #tpu.memory_space<vmem>>, vector<64x192xf32>,
    %8 = tpu.iota {dimensions = array<i32: 1>} : vector<1x192xi32>
    %c32_i32 = arith.constant 32 : i32
    %9 = vector.broadcast %c32_i32 : i32 to vector<1x192xi32>
    %10 = arith.cmpi slt, %8, %9 : vector<1x192xi32>
    %c64_i32 = arith.constant 64 : i32
    %11 = vector.broadcast %c64_i32 : i32 to vector<1x192xi32>
    %12 = arith.cmpi sge, %8, %11 : vector<1x192xi32>
    %c96_i32 = arith.constant 96 : i32
    %13 = vector.broadcast %c96_i32 : i32 to vector<1x192xi32>
    %14 = arith.cmpi slt, %8, %13 : vector<1x192xi32>
    %15 = arith.andi %12, %14 : vector<1x192xi1>
    %16 = arith.ori %10, %15 : vector<1x192xi1>
    %c128_i32 = arith.constant 128 : i32
    %17 = vector.broadcast %c128_i32 : i32 to vector<1x192xi32>
    %18 = arith.cmpi sge, %8, %17 : vector<1x192xi32>
    %c160_i32 = arith.constant 160 : i32
    %19 = vector.broadcast %c160_i32 : i32 to vector<1x192xi32>
    %20 = arith.cmpi slt, %8, %19 : vector<1x192xi32>
    %21 = arith.andi %18, %20 : vector<1x192xi1>
    %22 = arith.ori %16, %21 : vector<1x192xi1>
    %cst_8 = arith.constant 0.000000e+00 : f32
    %23 = vector.broadcast %cst_8 : f32 to vector<8x64xf32>
    %c0_i32 = arith.constant 0 : i32
    %c8_i32 = arith.constant 8 : i32
    %24 = arith.muli %c0_i32, %c8_i32 : i32
    %25 = tpu.assume_multiple %24, 8 : i32
    %c7_i32 = arith.constant 7 : i32
    %26 = arith.subi %c7_i32, %c0_i32 : i32
    %c8_i32_9 = arith.constant 8 : i32
    %27 = arith.muli %26, %c8_i32_9 : i32
    %28 = tpu.assume_multiple %27, 8 : i32
    %29 = arith.index_cast %25 : i32 to index
    %c0_10 = arith.constant 0 : index
    %30 = vector.load %arg9[%29, %c0_10] : memref<64x192xf32, #tpu.memory_space<vmem>>, vector<8x192xf32>
    %31 = arith.index_cast %28 : i32 to index
    %c0_11 = arith.constant 0 : index
    %32 = vector.load %arg9[%31, %c0_11] : memref<64x192xf32, #tpu.memory_space<vmem>>, vector<8x192xf32>
    %33 = vector.shape_cast %22 : vector<1x192xi1> to vector<1x192xi1>
    %34 = vector.broadcast %33 : vector<1x192xi1> to vector<8x192xi1>
    %35 = arith.select %34, %30, %32 : vector<8x192xi1>, vector<8x192xf32>
    %c0_12 = arith.constant 0 : index
    %c0_13 = arith.constant 0 : index
    %36 = vector.load %arg4[%c0_12, %c0_13] : memref<64x192xf32, #tpu.memory_space<vmem>>, vector<64x192xf32>
    %cst_14 = arith.constant dense<0.000000e+00> : vector<8x192xf32>
    %37 = tpu.matmul %23, %36, %cst_14 {dimension_numbers = #tpu.dot_dimension_numbers<[1], [0], [0], [1], [0, 0, 1, 1], [], []>} : vector<8x64xf32>, vector<64x192xf32>, vector<8x192xf32> -> vector<8x192xf32>
    %38 = vector.extract_strided_slice %35 {offsets = [0, 0], sizes = [8, 128], strides = [1, 1]} : vector<8x192xf32> to vector<8x128xf32>
    %39 = vector.extract_strided_slice %37 {offsets = [0, 0], sizes = [8, 128], strides = [1, 1]} : vector<8x192xf32> to vector<8x128xf32>
    %40 = arith.addf %38, %39 : vector<8x128xf32>
    %41 = arith.negf %40 : vector<8x128xf32>
    %42 = math.exp %41 : vector<8x128xf32>
    %cst_15 = arith.constant 1.000000e+00 : f32
    %43 = vector.broadcast %cst_15 : f32 to vector<8x128xf32>
    %44 = arith.addf %43, %42 : vector<8x128xf32>
    %45 = arith.divf %43, %44 : vector<8x128xf32>
    %46 = vector.extract_strided_slice %45 {offsets = [0, 0], sizes = [8, 64], strides = [1, 1]} : vector<8x128xf32> to vector<8x64xf32>
    %47 = vector.extract_strided_slice %45 {offsets = [0, 64], sizes = [8, 64], strides = [1, 1]} : vector<8x128xf32> to vector<8x64xf32>
    %48 = vector.extract_strided_slice %35 {offsets = [0, 128], sizes = [8, 64], strides = [1, 1]} : vector<8x192xf32> to vector<8x64xf32>
    %49 = vector.extract_strided_slice %37 {offsets = [0, 128], sizes = [8, 64], strides = [1, 1]} : vector<8x192xf32> to vector<8x64xf32>
    %c0_16 = arith.constant 0 : index
    %c0_17 = arith.constant 0 : index
    %50 = vector.load %arg5[%c0_16, %c0_17] : memref<1x64xf32, #tpu.memory_space<vmem>>, vector<1x64xf32>
    %51 = vector.broadcast %50 : vector<1x64xf32> to vector<8x64xf32>
    %52 = arith.addf %49, %51 : vector<8x64xf32>
    %53 = arith.mulf %46, %52 : vector<8x64xf32>
    %54 = arith.addf %48, %53 : vector<8x64xf32>
    %55 = math.tanh %54 : vector<8x64xf32>
    %56 = arith.subf %23, %55 : vector<8x64xf32>
    %57 = arith.mulf %47, %56 : vector<8x64xf32>
    %58 = arith.addf %55, %57 : vector<8x64xf32>
    %c1_i32 = arith.constant 1 : i32
    %c8_i32_18 = arith.constant 8 : i32
    %59 = arith.muli %c1_i32, %c8_i32_18 : i32
    %60 = tpu.assume_multiple %59, 8 : i32
    %c7_i32_19 = arith.constant 7 : i32
    %61 = arith.subi %c7_i32_19, %c1_i32 : i32
    %c8_i32_20 = arith.constant 8 : i32
    %62 = arith.muli %61, %c8_i32_20 : i32
    %63 = tpu.assume_multiple %62, 8 : i32
    %64 = arith.index_cast %60 : i32 to index
    %c0_21 = arith.constant 0 : index
    %65 = vector.load %arg9[%64, %c0_21] : memref<64x192xf32, #tpu.memory_space<vmem>>, vector<8x192xf32>
    %66 = arith.index_cast %63 : i32 to index
    %c0_22 = arith.constant 0 : index
    %67 = vector.load %arg9[%66, %c0_22] : memref<64x192xf32, #tpu.memory_space<vmem>>, vector<8x192xf32>
    %68 = vector.shape_cast %22 : vector<1x192xi1> to vector<1x192xi1>
    %69 = vector.broadcast %68 : vector<1x192xi1> to vector<8x192xi1>
    %70 = arith.select %69, %65, %67 : vector<8x192xi1>, vector<8x192xf32>
    %c0_23 = arith.constant 0 : index
    %c0_24 = arith.constant 0 : index
    %71 = vector.load %arg4[%c0_23, %c0_24] : memref<64x192xf32, #tpu.memory_space<vmem>>, vector<64x192xf32>
    %cst_25 = arith.constant dense<0.000000e+00> : vector<8x192xf32>
    %72 = tpu.matmul %58, %71, %cst_25 {dimension_numbers = #tpu.dot_dimension_numbers<[1], [0], [0], [1], [0, 0, 1, 1], [], []>} : vector<8x64xf32>, vector<64x192xf32>, vector<8x192xf32> -> vector<8x192xf32>
    %73 = vector.extract_strided_slice %70 {offsets = [0, 0], sizes = [8, 128], strides = [1, 1]} : vector<8x192xf32> to vector<8x128xf32>
    %74 = vector.extract_strided_slice %72 {offsets = [0, 0], sizes = [8, 128], strides = [1, 1]} : vector<8x192xf32> to vector<8x128xf32>
    %75 = arith.addf %73, %74 : vector<8x128xf32>
    %76 = arith.negf %75 : vector<8x128xf32>
    %77 = math.exp %76 : vector<8x128xf32>
    %cst_26 = arith.constant 1.000000e+00 : f32
    %78 = vector.broadcast %cst_26 : f32 to vector<8x128xf32>
    %79 = arith.addf %78, %77 : vector<8x128xf32>
    %80 = arith.divf %78, %79 : vector<8x128xf32>
    %81 = vector.extract_strided_slice %80 {offsets = [0, 0], sizes = [8, 64], strides = [1, 1]} : vector<8x128xf32> to vector<8x64xf32>
    %82 = vector.extract_strided_slice %80 {offsets = [0, 64], sizes = [8, 64], strides = [1, 1]} : vector<8x128xf32> to vector<8x64xf32>
    %83 = vector.extract_strided_slice %70 {offsets = [0, 128], sizes = [8, 64], strides = [1, 1]} : vector<8x192xf32> to vector<8x64xf32>
    %84 = vector.extract_strided_slice %72 {offsets = [0, 128], sizes = [8, 64], strides = [1, 1]} : vector<8x192xf32> to vector<8x64xf32>
    %c0_27 = arith.constant 0 : index
    %c0_28 = arith.constant 0 : index
    %85 = vector.load %arg5[%c0_27, %c0_28] : memref<1x64xf32, #tpu.memory_space<vmem>>, vector<1x64xf32>
    %86 = vector.broadcast %85 : vector<1x64xf32> to vector<8x64xf32>
    %87 = arith.addf %84, %86 : vector<8x64xf32>
    %88 = arith.mulf %81, %87 : vector<8x64xf32>
    %89 = arith.addf %83, %88 : vector<8x64xf32>
    %90 = math.tanh %89 : vector<8x64xf32>
    %91 = arith.subf %58, %90 : vector<8x64xf32>
    %92 = arith.mulf %82, %91 : vector<8x64xf32>
    %93 = arith.addf %90, %92 : vector<8x64xf32>
    %c2_i32 = arith.constant 2 : i32
    %c8_i32_29 = arith.constant 8 : i32
    %94 = arith.muli %c2_i32, %c8_i32_29 : i32
    %95 = tpu.assume_multiple %94, 8 : i32
    %c7_i32_30 = arith.constant 7 : i32
    %96 = arith.subi %c7_i32_30, %c2_i32 : i32
    %c8_i32_31 = arith.constant 8 : i32
    %97 = arith.muli %96, %c8_i32_31 : i32
    %98 = tpu.assume_multiple %97, 8 : i32
    %99 = arith.index_cast %95 : i32 to index
    %c0_32 = arith.constant 0 : index
    %100 = vector.load %arg9[%99, %c0_32] : memref<64x192xf32, #tpu.memory_space<vmem>>, vector<8x192xf32>
    %101 = arith.index_cast %98 : i32 to index
    %c0_33 = arith.constant 0 : index
    %102 = vector.load %arg9[%101, %c0_33] : memref<64x192xf32, #tpu.memory_space<vmem>>, vector<8x192xf32>
    %103 = vector.shape_cast %22 : vector<1x192xi1> to vector<1x192xi1>
    %104 = vector.broadcast %103 : vector<1x192xi1> to vector<8x192xi1>
    %105 = arith.select %104, %100, %102 : vector<8x192xi1>, vector<8x192xf32>
    %c0_34 = arith.constant 0 : index
    %c0_35 = arith.constant 0 : index
    %106 = vector.load %arg4[%c0_34, %c0_35] : memref<64x192xf32, #tpu.memory_space<vmem>>, vector<64x192xf32>
    %cst_36 = arith.constant dense<0.000000e+00> : vector<8x192xf32>
    %107 = tpu.matmul %93, %106, %cst_36 {dimension_numbers = #tpu.dot_dimension_numbers<[1], [0], [0], [1], [0, 0, 1, 1], [], []>} : vector<8x64xf32>, vector<64x192xf32>, vector<8x192xf32> -> vector<8x192xf32>
    %108 = vector.extract_strided_slice %105 {offsets = [0, 0], sizes = [8, 128], strides = [1, 1]} : vector<8x192xf32> to vector<8x128xf32>
    %109 = vector.extract_strided_slice %107 {offsets = [0, 0], sizes = [8, 128], strides = [1, 1]} : vector<8x192xf32> to vector<8x128xf32>
    %110 = arith.addf %108, %109 : vector<8x128xf32>
    %111 = arith.negf %110 : vector<8x128xf32>
    %112 = math.exp %111 : vector<8x128xf32>
    %cst_37 = arith.constant 1.000000e+00 : f32
    %113 = vector.broadcast %cst_37 : f32 to vector<8x128xf32>
    %114 = arith.addf %113, %112 : vector<8x128xf32>
    %115 = arith.divf %113, %114 : vector<8x128xf32>
    %116 = vector.extract_strided_slice %115 {offsets = [0, 0], sizes = [8, 64], strides = [1, 1]} : vector<8x128xf32> to vector<8x64xf32>
    %117 = vector.extract_strided_slice %115 {offsets = [0, 64], sizes = [8, 64], strides = [1, 1]} : vector<8x128xf32> to vector<8x64xf32>
    %118 = vector.extract_strided_slice %105 {offsets = [0, 128], sizes = [8, 64], strides = [1, 1]} : vector<8x192xf32> to vector<8x64xf32>
    %119 = vector.extract_strided_slice %107 {offsets = [0, 128], sizes = [8, 64], strides = [1, 1]} : vector<8x192xf32> to vector<8x64xf32>
    %c0_38 = arith.constant 0 : index
    %c0_39 = arith.constant 0 : index
    %120 = vector.load %arg5[%c0_38, %c0_39] : memref<1x64xf32, #tpu.memory_space<vmem>>, vector<1x64xf32>
    %121 = vector.broadcast %120 : vector<1x64xf32> to vector<8x64xf32>
    %122 = arith.addf %119, %121 : vector<8x64xf32>
    %123 = arith.mulf %116, %122 : vector<8x64xf32>
    %124 = arith.addf %118, %123 : vector<8x64xf32>
    %125 = math.tanh %124 : vector<8x64xf32>
    %126 = arith.subf %93, %125 : vector<8x64xf32>
    %127 = arith.mulf %117, %126 : vector<8x64xf32>
    %128 = arith.addf %125, %127 : vector<8x64xf32>
    %c3_i32 = arith.constant 3 : i32
    %c8_i32_40 = arith.constant 8 : i32
    %129 = arith.muli %c3_i32, %c8_i32_40 : i32
    %130 = tpu.assume_multiple %129, 8 : i32
    %c7_i32_41 = arith.constant 7 : i32
    %131 = arith.subi %c7_i32_41, %c3_i32 : i32
    %c8_i32_42 = arith.constant 8 : i32
    %132 = arith.muli %131, %c8_i32_42 : i32
    %133 = tpu.assume_multiple %132, 8 : i32
    %134 = arith.index_cast %130 : i32 to index
    %c0_43 = arith.constant 0 : index
    %135 = vector.load %arg9[%134, %c0_43] : memref<64x192xf32, #tpu.memory_space<vmem>>, vector<8x192xf32>
    %136 = arith.index_cast %133 : i32 to index
    %c0_44 = arith.constant 0 : index
    %137 = vector.load %arg9[%136, %c0_44] : memref<64x192xf32, #tpu.memory_space<vmem>>, vector<8x192xf32>
    %138 = vector.shape_cast %22 : vector<1x192xi1> to vector<1x192xi1>
    %139 = vector.broadcast %138 : vector<1x192xi1> to vector<8x192xi1>
    %140 = arith.select %139, %135, %137 : vector<8x192xi1>, vector<8x192xf32>
    %c0_45 = arith.constant 0 : index
    %c0_46 = arith.constant 0 : index
    %141 = vector.load %arg4[%c0_45, %c0_46] : memref<64x192xf32, #tpu.memory_space<vmem>>, vector<64x192xf32>
    %cst_47 = arith.constant dense<0.000000e+00> : vector<8x192xf32>
    %142 = tpu.matmul %128, %141, %cst_47 {dimension_numbers = #tpu.dot_dimension_numbers<[1], [0], [0], [1], [0, 0, 1, 1], [], []>} : vector<8x64xf32>, vector<64x192xf32>, vector<8x192xf32> -> vector<8x192xf32>
    %143 = vector.extract_strided_slice %140 {offsets = [0, 0], sizes = [8, 128], strides = [1, 1]} : vector<8x192xf32> to vector<8x128xf32>
    %144 = vector.extract_strided_slice %142 {offsets = [0, 0], sizes = [8, 128], strides = [1, 1]} : vector<8x192xf32> to vector<8x128xf32>
    %145 = arith.addf %143, %144 : vector<8x128xf32>
    %146 = arith.negf %145 : vector<8x128xf32>
    %147 = math.exp %146 : vector<8x128xf32>
    %cst_48 = arith.constant 1.000000e+00 : f32
    %148 = vector.broadcast %cst_48 : f32 to vector<8x128xf32>
    %149 = arith.addf %148, %147 : vector<8x128xf32>
    %150 = arith.divf %148, %149 : vector<8x128xf32>
    %151 = vector.extract_strided_slice %150 {offsets = [0, 0], sizes = [8, 64], strides = [1, 1]} : vector<8x128xf32> to vector<8x64xf32>
    %152 = vector.extract_strided_slice %150 {offsets = [0, 64], sizes = [8, 64], strides = [1, 1]} : vector<8x128xf32> to vector<8x64xf32>
    %153 = vector.extract_strided_slice %140 {offsets = [0, 128], sizes = [8, 64], strides = [1, 1]} : vector<8x192xf32> to vector<8x64xf32>
    %154 = vector.extract_strided_slice %142 {offsets = [0, 128], sizes = [8, 64], strides = [1, 1]} : vector<8x192xf32> to vector<8x64xf32>
    %c0_49 = arith.constant 0 : index
    %c0_50 = arith.constant 0 : index
    %155 = vector.load %arg5[%c0_49, %c0_50] : memref<1x64xf32, #tpu.memory_space<vmem>>, vector<1x64xf32>
    %156 = vector.broadcast %155 : vector<1x64xf32> to vector<8x64xf32>
    %157 = arith.addf %154, %156 : vector<8x64xf32>
    %158 = arith.mulf %151, %157 : vector<8x64xf32>
    %159 = arith.addf %153, %158 : vector<8x64xf32>
    %160 = math.tanh %159 : vector<8x64xf32>
    %161 = arith.subf %128, %160 : vector<8x64xf32>
    %162 = arith.mulf %152, %161 : vector<8x64xf32>
    %163 = arith.addf %160, %162 : vector<8x64xf32>
    %c4_i32 = arith.constant 4 : i32
    %c8_i32_51 = arith.constant 8 : i32
    %164 = arith.muli %c4_i32, %c8_i32_51 : i32
    %165 = tpu.assume_multiple %164, 8 : i32
    %c7_i32_52 = arith.constant 7 : i32
    %166 = arith.subi %c7_i32_52, %c4_i32 : i32
    %c8_i32_53 = arith.constant 8 : i32
    %167 = arith.muli %166, %c8_i32_53 : i32
    %168 = tpu.assume_multiple %167, 8 : i32
    %169 = arith.index_cast %165 : i32 to index
    %c0_54 = arith.constant 0 : index
    %170 = vector.load %arg9[%169, %c0_54] : memref<64x192xf32, #tpu.memory_space<vmem>>, vector<8x192xf32>
    %171 = arith.index_cast %168 : i32 to index
    %c0_55 = arith.constant 0 : index
    %172 = vector.load %arg9[%171, %c0_55] : memref<64x192xf32, #tpu.memory_space<vmem>>, vector<8x192xf32>
    %173 = vector.shape_cast %22 : vector<1x192xi1> to vector<1x192xi1>
    %174 = vector.broadcast %173 : vector<1x192xi1> to vector<8x192xi1>
    %175 = arith.select %174, %170, %172 : vector<8x192xi1>, vector<8x192xf32>
    %c0_56 = arith.constant 0 : index
    %c0_57 = arith.constant 0 : index
    %176 = vector.load %arg4[%c0_56, %c0_57] : memref<64x192xf32, #tpu.memory_space<vmem>>, vector<64x192xf32>
    %cst_58 = arith.constant dense<0.000000e+00> : vector<8x192xf32>
    %177 = tpu.matmul %163, %176, %cst_58 {dimension_numbers = #tpu.dot_dimension_numbers<[1], [0], [0], [1], [0, 0, 1, 1], [], []>} : vector<8x64xf32>, vector<64x192xf32>, vector<8x192xf32> -> vector<8x192xf32>
    %178 = vector.extract_strided_slice %175 {offsets = [0, 0], sizes = [8, 128], strides = [1, 1]} : vector<8x192xf32> to vector<8x128xf32>
    %179 = vector.extract_strided_slice %177 {offsets = [0, 0], sizes = [8, 128], strides = [1, 1]} : vector<8x192xf32> to vector<8x128xf32>
    %180 = arith.addf %178, %179 : vector<8x128xf32>
    %181 = arith.negf %180 : vector<8x128xf32>
    %182 = math.exp %181 : vector<8x128xf32>
    %cst_59 = arith.constant 1.000000e+00 : f32
    %183 = vector.broadcast %cst_59 : f32 to vector<8x128xf32>
    %184 = arith.addf %183, %182 : vector<8x128xf32>
    %185 = arith.divf %183, %184 : vector<8x128xf32>
    %186 = vector.extract_strided_slice %185 {offsets = [0, 0], sizes = [8, 64], strides = [1, 1]} : vector<8x128xf32> to vector<8x64xf32>
    %187 = vector.extract_strided_slice %185 {offsets = [0, 64], sizes = [8, 64], strides = [1, 1]} : vector<8x128xf32> to vector<8x64xf32>
    %188 = vector.extract_strided_slice %175 {offsets = [0, 128], sizes = [8, 64], strides = [1, 1]} : vector<8x192xf32> to vector<8x64xf32>
    %189 = vector.extract_strided_slice %177 {offsets = [0, 128], sizes = [8, 64], strides = [1, 1]} : vector<8x192xf32> to vector<8x64xf32>
    %c0_60 = arith.constant 0 : index
    %c0_61 = arith.constant 0 : index
    %190 = vector.load %arg5[%c0_60, %c0_61] : memref<1x64xf32, #tpu.memory_space<vmem>>, vector<1x64xf32>
    %191 = vector.broadcast %190 : vector<1x64xf32> to vector<8x64xf32>
    %192 = arith.addf %189, %191 : vector<8x64xf32>
    %193 = arith.mulf %186, %192 : vector<8x64xf32>
    %194 = arith.addf %188, %193 : vector<8x64xf32>
    %195 = math.tanh %194 : vector<8x64xf32>
    %196 = arith.subf %163, %195 : vector<8x64xf32>
    %197 = arith.mulf %187, %196 : vector<8x64xf32>
    %198 = arith.addf %195, %197 : vector<8x64xf32>
    %c5_i32 = arith.constant 5 : i32
    %c8_i32_62 = arith.constant 8 : i32
    %199 = arith.muli %c5_i32, %c8_i32_62 : i32
    %200 = tpu.assume_multiple %199, 8 : i32
    %c7_i32_63 = arith.constant 7 : i32
    %201 = arith.subi %c7_i32_63, %c5_i32 : i32
    %c8_i32_64 = arith.constant 8 : i32
    %202 = arith.muli %201, %c8_i32_64 : i32
    %203 = tpu.assume_multiple %202, 8 : i32
    %204 = arith.index_cast %200 : i32 to index
    %c0_65 = arith.constant 0 : index
    %205 = vector.load %arg9[%204, %c0_65] : memref<64x192xf32, #tpu.memory_space<vmem>>, vector<8x192xf32>
    %206 = arith.index_cast %203 : i32 to index
    %c0_66 = arith.constant 0 : index
    %207 = vector.load %arg9[%206, %c0_66] : memref<64x192xf32, #tpu.memory_space<vmem>>, vector<8x192xf32>
    %208 = vector.shape_cast %22 : vector<1x192xi1> to vector<1x192xi1>
    %209 = vector.broadcast %208 : vector<1x192xi1> to vector<8x192xi1>
    %210 = arith.select %209, %205, %207 : vector<8x192xi1>, vector<8x192xf32>
    %c0_67 = arith.constant 0 : index
    %c0_68 = arith.constant 0 : index
    %211 = vector.load %arg4[%c0_67, %c0_68] : memref<64x192xf32, #tpu.memory_space<vmem>>, vector<64x192xf32>
    %cst_69 = arith.constant dense<0.000000e+00> : vector<8x192xf32>
    %212 = tpu.matmul %198, %211, %cst_69 {dimension_numbers = #tpu.dot_dimension_numbers<[1], [0], [0], [1], [0, 0, 1, 1], [], []>} : vector<8x64xf32>, vector<64x192xf32>, vector<8x192xf32> -> vector<8x192xf32>
    %213 = vector.extract_strided_slice %210 {offsets = [0, 0], sizes = [8, 128], strides = [1, 1]} : vector<8x192xf32> to vector<8x128xf32>
    %214 = vector.extract_strided_slice %212 {offsets = [0, 0], sizes = [8, 128], strides = [1, 1]} : vector<8x192xf32> to vector<8x128xf32>
    %215 = arith.addf %213, %214 : vector<8x128xf32>
    %216 = arith.negf %215 : vector<8x128xf32>
    %217 = math.exp %216 : vector<8x128xf32>
    %cst_70 = arith.constant 1.000000e+00 : f32
    %218 = vector.broadcast %cst_70 : f32 to vector<8x128xf32>
    %219 = arith.addf %218, %217 : vector<8x128xf32>
    %220 = arith.divf %218, %219 : vector<8x128xf32>
    %221 = vector.extract_strided_slice %220 {offsets = [0, 0], sizes = [8, 64], strides = [1, 1]} : vector<8x128xf32> to vector<8x64xf32>
    %222 = vector.extract_strided_slice %220 {offsets = [0, 64], sizes = [8, 64], strides = [1, 1]} : vector<8x128xf32> to vector<8x64xf32>
    %223 = vector.extract_strided_slice %210 {offsets = [0, 128], sizes = [8, 64], strides = [1, 1]} : vector<8x192xf32> to vector<8x64xf32>
    %224 = vector.extract_strided_slice %212 {offsets = [0, 128], sizes = [8, 64], strides = [1, 1]} : vector<8x192xf32> to vector<8x64xf32>
    %c0_71 = arith.constant 0 : index
    %c0_72 = arith.constant 0 : index
    %225 = vector.load %arg5[%c0_71, %c0_72] : memref<1x64xf32, #tpu.memory_space<vmem>>, vector<1x64xf32>
    %226 = vector.broadcast %225 : vector<1x64xf32> to vector<8x64xf32>
    %227 = arith.addf %224, %226 : vector<8x64xf32>
    %228 = arith.mulf %221, %227 : vector<8x64xf32>
    %229 = arith.addf %223, %228 : vector<8x64xf32>
    %230 = math.tanh %229 : vector<8x64xf32>
    %231 = arith.subf %198, %230 : vector<8x64xf32>
    %232 = arith.mulf %222, %231 : vector<8x64xf32>
    %233 = arith.addf %230, %232 : vector<8x64xf32>
    %c6_i32 = arith.constant 6 : i32
    %c8_i32_73 = arith.constant 8 : i32
    %234 = arith.muli %c6_i32, %c8_i32_73 : i32
    %235 = tpu.assume_multiple %234, 8 : i32
    %c7_i32_74 = arith.constant 7 : i32
    %236 = arith.subi %c7_i32_74, %c6_i32 : i32
    %c8_i32_75 = arith.constant 8 : i32
    %237 = arith.muli %236, %c8_i32_75 : i32
    %238 = tpu.assume_multiple %237, 8 : i32
    %239 = arith.index_cast %235 : i32 to index
    %c0_76 = arith.constant 0 : index
    %240 = vector.load %arg9[%239, %c0_76] : memref<64x192xf32, #tpu.memory_space<vmem>>, vector<8x192xf32>
    %241 = arith.index_cast %238 : i32 to index
    %c0_77 = arith.constant 0 : index
    %242 = vector.load %arg9[%241, %c0_77] : memref<64x192xf32, #tpu.memory_space<vmem>>, vector<8x192xf32>
    %243 = vector.shape_cast %22 : vector<1x192xi1> to vector<1x192xi1>
    %244 = vector.broadcast %243 : vector<1x192xi1> to vector<8x192xi1>
    %245 = arith.select %244, %240, %242 : vector<8x192xi1>, vector<8x192xf32>
    %c0_78 = arith.constant 0 : index
    %c0_79 = arith.constant 0 : index
    %246 = vector.load %arg4[%c0_78, %c0_79] : memref<64x192xf32, #tpu.memory_space<vmem>>, vector<64x192xf32>
    %cst_80 = arith.constant dense<0.000000e+00> : vector<8x192xf32>
    %247 = tpu.matmul %233, %246, %cst_80 {dimension_numbers = #tpu.dot_dimension_numbers<[1], [0], [0], [1], [0, 0, 1, 1], [], []>} : vector<8x64xf32>, vector<64x192xf32>, vector<8x192xf32> -> vector<8x192xf32>
    %248 = vector.extract_strided_slice %245 {offsets = [0, 0], sizes = [8, 128], strides = [1, 1]} : vector<8x192xf32> to vector<8x128xf32>
    %249 = vector.extract_strided_slice %247 {offsets = [0, 0], sizes = [8, 128], strides = [1, 1]} : vector<8x192xf32> to vector<8x128xf32>
    %250 = arith.addf %248, %249 : vector<8x128xf32>
    %251 = arith.negf %250 : vector<8x128xf32>
    %252 = math.exp %251 : vector<8x128xf32>
    %cst_81 = arith.constant 1.000000e+00 : f32
    %253 = vector.broadcast %cst_81 : f32 to vector<8x128xf32>
    %254 = arith.addf %253, %252 : vector<8x128xf32>
    %255 = arith.divf %253, %254 : vector<8x128xf32>
    %256 = vector.extract_strided_slice %255 {offsets = [0, 0], sizes = [8, 64], strides = [1, 1]} : vector<8x128xf32> to vector<8x64xf32>
    %257 = vector.extract_strided_slice %255 {offsets = [0, 64], sizes = [8, 64], strides = [1, 1]} : vector<8x128xf32> to vector<8x64xf32>
    %258 = vector.extract_strided_slice %245 {offsets = [0, 128], sizes = [8, 64], strides = [1, 1]} : vector<8x192xf32> to vector<8x64xf32>
    %259 = vector.extract_strided_slice %247 {offsets = [0, 128], sizes = [8, 64], strides = [1, 1]} : vector<8x192xf32> to vector<8x64xf32>
    %c0_82 = arith.constant 0 : index
    %c0_83 = arith.constant 0 : index
    %260 = vector.load %arg5[%c0_82, %c0_83] : memref<1x64xf32, #tpu.memory_space<vmem>>, vector<1x64xf32>
    %261 = vector.broadcast %260 : vector<1x64xf32> to vector<8x64xf32>
    %262 = arith.addf %259, %261 : vector<8x64xf32>
    %263 = arith.mulf %256, %262 : vector<8x64xf32>
    %264 = arith.addf %258, %263 : vector<8x64xf32>
    %265 = math.tanh %264 : vector<8x64xf32>
    %266 = arith.subf %233, %265 : vector<8x64xf32>
    %267 = arith.mulf %257, %266 : vector<8x64xf32>
    %268 = arith.addf %265, %267 : vector<8x64xf32>
    %c7_i32_84 = arith.constant 7 : i32
    %c8_i32_85 = arith.constant 8 : i32
    %269 = arith.muli %c7_i32_84, %c8_i32_85 : i32
    %270 = tpu.assume_multiple %269, 8 : i32
    %c7_i32_86 = arith.constant 7 : i32
    %271 = arith.subi %c7_i32_86, %c7_i32_84 : i32
    %c8_i32_87 = arith.constant 8 : i32
    %272 = arith.muli %271, %c8_i32_87 : i32
    %273 = tpu.assume_multiple %272, 8 : i32
    %274 = arith.index_cast %270 : i32 to index
    %c0_88 = arith.constant 0 : index
    %275 = vector.load %arg9[%274, %c0_88] : memref<64x192xf32, #tpu.memory_space<vmem>>, vector<8x192xf32>
    %276 = arith.index_cast %273 : i32 to index
    %c0_89 = arith.constant 0 : index
    %277 = vector.load %arg9[%276, %c0_89] : memref<64x192xf32, #tpu.memory_space<vmem>>, vector<8x192xf32>
    %278 = vector.shape_cast %22 : vector<1x192xi1> to vector<1x192xi1>
    %279 = vector.broadcast %278 : vector<1x192xi1> to vector<8x192xi1>
    %280 = arith.select %279, %275, %277 : vector<8x192xi1>, vector<8x192xf32>
    %c0_90 = arith.constant 0 : index
    %c0_91 = arith.constant 0 : index
    %281 = vector.load %arg4[%c0_90, %c0_91] : memref<64x192xf32, #tpu.memory_space<vmem>>, vector<64x192xf32>
    %cst_92 = arith.constant dense<0.000000e+00> : vector<8x192xf32>
    %282 = tpu.matmul %268, %281, %cst_92 {dimension_numbers = #tpu.dot_dimension_numbers<[1], [0], [0], [1], [0, 0, 1, 1], [], []>} : vector<8x64xf32>, vector<64x192xf32>, vector<8x192xf32> -> vector<8x192xf32>
    %283 = vector.extract_strided_slice %280 {offsets = [0, 0], sizes = [8, 128], strides = [1, 1]} : vector<8x192xf32> to vector<8x128xf32>
    %284 = vector.extract_strided_slice %282 {offsets = [0, 0], sizes = [8, 128], strides = [1, 1]} : vector<8x192xf32> to vector<8x128xf32>
    %285 = arith.addf %283, %284 : vector<8x128xf32>
    %286 = arith.negf %285 : vector<8x128xf32>
    %287 = math.exp %286 : vector<8x128xf32>
    %cst_93 = arith.constant 1.000000e+00 : f32
    %288 = vector.broadcast %cst_93 : f32 to vector<8x128xf32>
    %289 = arith.addf %288, %287 : vector<8x128xf32>
    %290 = arith.divf %288, %289 : vector<8x128xf32>
    %291 = vector.extract_strided_slice %290 {offsets = [0, 0], sizes = [8, 64], strides = [1, 1]} : vector<8x128xf32> to vector<8x64xf32>
    %292 = vector.extract_strided_slice %290 {offsets = [0, 64], sizes = [8, 64], strides = [1, 1]} : vector<8x128xf32> to vector<8x64xf32>
    %293 = vector.extract_strided_slice %280 {offsets = [0, 128], sizes = [8, 64], strides = [1, 1]} : vector<8x192xf32> to vector<8x64xf32>
    %294 = vector.extract_strided_slice %282 {offsets = [0, 128], sizes = [8, 64], strides = [1, 1]} : vector<8x192xf32> to vector<8x64xf32>
    %c0_94 = arith.constant 0 : index
    %c0_95 = arith.constant 0 : index
    %295 = vector.load %arg5[%c0_94, %c0_95] : memref<1x64xf32, #tpu.memory_space<vmem>>, vector<1x64xf32>
    %296 = vector.broadcast %295 : vector<1x64xf32> to vector<8x64xf32>
    %297 = arith.addf %294, %296 : vector<8x64xf32>
    %298 = arith.mulf %291, %297 : vector<8x64xf32>
    %299 = arith.addf %293, %298 : vector<8x64xf32>
    %300 = math.tanh %299 : vector<8x64xf32>
    %301 = arith.subf %268, %300 : vector<8x64xf32>
    %302 = arith.mulf %292, %301 : vector<8x64xf32>
    %303 = arith.addf %300, %302 : vector<8x64xf32>
    %c8_i32_96 = arith.constant 8 : i32
    %c0_97 = arith.constant 0 : index
    %c0_98 = arith.constant 0 : index
    %304 = vector.load %arg6[%c0_97, %c0_98] : memref<64x128xf32, #tpu.memory_space<vmem>>, vector<64x128xf32>
    %cst_99 = arith.constant dense<0.000000e+00> : vector<8x128xf32>
    %305 = tpu.matmul %303, %304, %cst_99 {dimension_numbers = #tpu.dot_dimension_numbers<[1], [0], [0], [1], [0, 0, 1, 1], [], []>} : vector<8x64xf32>, vector<64x128xf32>, vector<8x128xf32> -> vector<8x128xf32>
    %c0_100 = arith.constant 0 : index
    %c0_101 = arith.constant 0 : index
    %306 = vector.load %arg7[%c0_100, %c0_101] : memref<1x128xf32, #tpu.memory_space<vmem>>, vector<1x128xf32>
    %307 = vector.broadcast %306 : vector<1x128xf32> to vector<8x128xf32>
    %308 = arith.addf %305, %307 : vector<8x128xf32>
    %c0_102 = arith.constant 0 : index
    %c0_103 = arith.constant 0 : index
    %309 = vector.load %arg8[%c0_102, %c0_103] : memref<8x128xf32, #tpu.memory_space<vmem>>, vector<8x128xf32>
    tpu.vector_store %arg8[%c0_102, %c0_103], %308 {strides = array<i32>} : memref<8x128xf32, #tpu.memory_space<vmem>>, vector<8x128xf32>,
    return
  }
  func.func @transform_0(%arg0: i32) -> (i32, i32, i32) {
    %c0_i32 = arith.constant 0 : i32
    %c0_i32_0 = arith.constant 0 : i32
    %c0_i32_1 = arith.constant 0 : i32
    return %arg0, %c0_i32, %c0_i32_0 : i32, i32, i32
  }
  func.func @transform_1(%arg0: i32) -> (i32, i32) {
    %c0_i32 = arith.constant 0 : i32
    %c0_i32_0 = arith.constant 0 : i32
    %c0_i32_1 = arith.constant 0 : i32
    return %c0_i32, %c0_i32_0 : i32, i32
  }
  func.func @transform_2(%arg0: i32) -> (i32, i32) {
    %c0_i32 = arith.constant 0 : i32
    %c0_i32_0 = arith.constant 0 : i32
    %c0_i32_1 = arith.constant 0 : i32
    return %c0_i32, %c0_i32_0 : i32, i32
  }
  func.func @transform_3(%arg0: i32) -> (i32, i32) {
    %c0_i32 = arith.constant 0 : i32
    %c0_i32_0 = arith.constant 0 : i32
    %c0_i32_1 = arith.constant 0 : i32
    return %c0_i32, %c0_i32_0 : i32, i32
  }
  func.func @transform_4(%arg0: i32) -> (i32, i32) {
    %c0_i32 = arith.constant 0 : i32
    %c0_i32_0 = arith.constant 0 : i32
    %c0_i32_1 = arith.constant 0 : i32
    return %c0_i32, %c0_i32_0 : i32, i32
  }
  func.func @transform_5(%arg0: i32) -> (i32, i32) {
    %c0_i32 = arith.constant 0 : i32
    %c0_i32_0 = arith.constant 0 : i32
    %c0_i32_1 = arith.constant 0 : i32
    return %c0_i32, %c0_i32_0 : i32, i32
  }
  func.func @transform_6(%arg0: i32) -> (i32, i32) {
    %c0_i32 = arith.constant 0 : i32
    %c0_i32_0 = arith.constant 0 : i32
    %c0_i32_1 = arith.constant 0 : i32
    return %c0_i32, %c0_i32_0 : i32, i32
  }
  func.func @transform_7(%arg0: i32) -> (i32, i32) {
    %c0_i32 = arith.constant 0 : i32
    %c0_i32_0 = arith.constant 0 : i32
    return %arg0, %c0_i32 : i32, i32
  }
}

</mosaic_0001>

<bundles_post_ra>
// kernel: tpu_custom_call.1
= control target key start
LH: loop header
LB: loop body
LE: loop exit
PB: predicated region body
PF: predicated region fallthrough
CT: control target
= control target key end

     0   :  { %12 = vsyncpa [#allocation4], 0  ;;  %s1971_s0 = inlined_call_operand.vmem [shape: f32[1,64,16], index: 0, kind: input, shape index: {}]   ;;  %s1972_s1 = inlined_call_operand.vmem [shape: f32[16,192], index: 1, kind: input, shape index: {}]   ;;  %s1973_s2 = inlined_call_operand.vmem [shape: f32[1,192], index: 2, kind: input, shape index: {}]   ;;  %s1974_s3 = inlined_call_operand.hbm [shape: f32[64,192], index: 3, kind: input, shape index: {}]   ;;  %s1975_s4 = inlined_call_operand.hbm [shape: f32[1,64], index: 4, kind: input, shape index: {}]   ;;  %s1976_s5 = inlined_call_operand.vmem [shape: f32[64,128], index: 5, kind: input, shape index: {}]   ;;  %s1977_s6 = inlined_call_operand.vmem [shape: f32[1,128], index: 6, kind: input, shape index: {}]   ;;  %s1978_s7 = inlined_call_operand.hbm [shape: f32[8,128], index: 7, kind: output, shape index: {}]  }
   0x1   :  { %13 = vsyncpa [#allocation7], 0 }
   0x2   :  { %14 = vsyncpa [#allocation5], 0  ;;  %s1543_s24 = smov [#allocation3]   ;;  %s1471_s28 = scalar_lea.hbm %s1974_s3, 2048 }
   0x3   :  { %s26_s25 = sshll.u32 %s1543_s24, 4  ;;  %p1472_p0 = scmp.ne.s32.totalorder %s1974_s3, %s1471_s28  ;;  %s27_s25 = int_to_ptr.vmem [resolvable:$true] %s26_s25 }
   0x4   :  { %p1475_p1 = scmp.lt.u32.totalorder %s1471_s28, %s1974_s3 }
   0x6   :  { %p1477_p2 = pnand %p1475_p1, %p1472_p0 }
   0x8   :  { %1480 = shalt.err (!%p1477_p2)
}
   0x9   :  { %s1481_s10 = scalar_lea.vmem %s27_s25, 2048  ;;  %p1486_p4 = scmp.lt.s32.totalorder %s27_s25, %s27_s25 }
   0xa   :  { %p1482_p3 = scmp.ne.s32.totalorder %s27_s25, %s1481_s10  ;;  %p1487_p5 = scmp.lt.s32.totalorder %s1481_s10, %s1481_s10 }
   0xc   :  { %p1488_p6 = por %p1487_p5, %p1486_p4 }
   0xe   :  { %p1489_p7 = pnand %p1488_p6, %p1482_p3 }
  0x10   :  { %1492 = shalt.err (!%p1489_p7)
}
  0x11   :  { %s1544_s11 = smov 256   ;;  %s1545_s12 = smov 16  }
  0x12   :  { %32 = dma.hbm_to_vmem [thread:$0]  %s1974_s3, 2048, %s27_s25, [#allocation4], %s1544_s11, %s1544_s11, %s1545_s12  }
  0x13   :  { %s1546_s15 = smov [#allocation6]   ;;  %s1493_s19 = scalar_lea.hbm %s1975_s4, 16 }
  0x14   :  { %s39_s16 = sshll.u32 %s1546_s15, 4  ;;  %p1494_p8 = scmp.ne.s32.totalorder %s1975_s4, %s1493_s19  ;;  %s40_s16 = int_to_ptr.vmem [resolvable:$true] %s39_s16 }
  0x15   :  { %p1497_p9 = scmp.lt.u32.totalorder %s1493_s19, %s1975_s4 }
  0x17   :  { %p1499_p10 = pnand %p1497_p9, %p1494_p8 }
  0x19   :  { %1502 = shalt.err (!%p1499_p10)
}
  0x1a   :  { %s1503_s24 = scalar_lea.vmem %s40_s16, 16  ;;  %s1507_s3 = scalar_lea.vmem %s40_s16, 32 }
  0x1b   :  { %p1504_p11 = scmp.ne.s32.totalorder %s40_s16, %s1503_s24  ;;  %p1508_p12 = scmp.lt.s32.totalorder %s40_s16, %s40_s16 }
  0x1c   :  { %p1509_p13 = scmp.lt.s32.totalorder %s1507_s3, %s1503_s24 }
  0x1e   :  { %p1510_p0 = por %p1509_p13, %p1508_p12 }
  0x20   :  { %p1511_p1 = pnand %p1510_p0, %p1504_p11 }
  0x22   :  { %1514 = shalt.err (!%p1511_p1)
}
  0x23   :  { %42 = dma.hbm_to_vmem [thread:$0]  %s1975_s4, 16, %s40_s16, [#allocation7]  }
  0x24   :  { %1537 = dma.done.wait [#allocation4], 2048  }
  0x25   :  { %1538 = vsyncadd [#allocation4], 4294965248 }
  0x26   :  { %1539 = dma.done.wait [#allocation7], 16  }
  0x27   :  { %1540 = vsyncadd [#allocation7], 4294967280  ;;  %v1547_v0 = vmov 0.0   ;;  %v62_v1 = vld [vmem:[%s1972_s1 + $0x8] sm:$0xff]  ;;  %v64_v2 = vld [vmem:[%s1972_s1 + $0x18] sm:$0xff]  ;;  %vm77_vm0 = vcmask 130048   ;;  %v67_v39 = vlaneseq }
  0x28   :  { %166 = vmatprep.mubr.f32.mxu0 %v1547_v0  ;;  %352 = vmatprep.mubr.f32.mxu1 %v1547_v0  ;;  %v61_v3 = vld [vmem:[%s1972_s1] sm:$0xff]  ;;  %v1270_v4 = vpack.c.bf16 %v64_v2, %v62_v1  ;;  %v63_v5 = vld [vmem:[%s1972_s1 + $0x10] sm:$0xff]  ;;  %v270_v7 = vld [vmem:[#allocation3 + $0x8] sm:$0xff]  ;;  %vm216_vm1 = vcmask 523264   ;;  %vm1550_vm8 = vmmov 0   ;;  %s1551_s18 = smov [#allocation8]  }
  0x29   :  { %v1272_v6 = vpack.c.bf16 %v63_v5, %v61_v3  ;;  %v272_v8 = vld [vmem:[#allocation3 + $0x18] sm:$0xff]  ;;  %v53_v9 = vld [vmem:[%s1971_s0] sm:$0xff]  ;;  %v271_v12 = vld [vmem:[#allocation3 + $0x10] sm:$0xff]  ;;  %v68_v40 = vshrl.u32 %v67_v39, 7  ;;  %v233_v54 = vand.u32 127, %v67_v39  ;;  %s1199_s19 = sshll.u32 %s1551_s18, 4  ;;  %s1200_s19 = int_to_ptr.vmem [resolvable:$true] %s1199_s19 }
  0x2a   :  { %1271 = vmatprep.subr.bf16.mxu0 %v1270_v4  ;;  %v1633_v10 = vpack.c.bf16 %v272_v8, %v270_v7  ;;  %v269_v11 = vld [vmem:[#allocation3] sm:$0xff]  ;;  %v274_v14 = vld [vmem:[#allocation3 + $0x28] sm:$0xff]  ;;  %v276_v15 = vld [vmem:[#allocation3 + $0x38] sm:$0xff]  ;;  %s1515_s20 = scalar_lea.vmem %s1200_s19, 128  ;;  %p1520_p3 = scmp.lt.s32.totalorder %s1200_s19, %s1200_s19 }
  0x2b   :  { %1273 = vmatpush1.bf16.msra.mxu0 %v1272_v6  ;;  %v1635_v13 = vpack.c.bf16 %v271_v12, %v269_v11  ;;  %v273_v16 = vld [vmem:[#allocation3 + $0x20] sm:$0xff]  ;;  %v1638_v17 = vpack.c.bf16 %v276_v15, %v274_v14  ;;  %v275_v18 = vld [vmem:[#allocation3 + $0x30] sm:$0xff]  ;;  %v278_v19 = vld [vmem:[#allocation3 + $0x48] sm:$0xff]  ;;  %v69_v41 = vsub.s32 0, %v68_v40  ;;  %v73_v43 = vsub.s32 1, %v68_v40  ;;  %p1516_p2 = scmp.ne.s32.totalorder %s1200_s19, %s1515_s20  ;;  %p1521_p4 = scmp.lt.s32.totalorder %s1515_s20, %s1515_s20 }
  0x2c   :  { %1275 = vmatprep.subr.bf16.mxu1 %v1633_v10  ;;  %1307 = vmatprep.subr.bf16.mxu0 %v1633_v10  ;;  %v1643_v20 = vpack.c.bf16 %v275_v18, %v273_v16  ;;  %v280_v21 = vld [vmem:[#allocation3 + $0x58] sm:$0xff]  ;;  %v54_v22 = vld [vmem:[%s1971_s0 + $0x8] sm:$0xff]  ;;  %v277_v24 = vld [vmem:[#allocation3 + $0x40] sm:$0xff]  ;;  %vm237_vm2 = vcmp.ge.s32.totalorder %v233_v54, 64  ;;  %vm239_vm3 = vcmp.lt.s32.totalorder %v233_v54, 96  ;;  %vm235_vm4 = vcmp.lt.s32.totalorder %v233_v54, 32 }
  0x2d   :  { %1277 = vmatpush1.bf16.msra.mxu1 %v1635_v13  ;;  %v1650_v23 = vpack.c.bf16 %v280_v21, %v278_v19  ;;  %v279_v25 = vld [vmem:[#allocation3 + $0x50] sm:$0xff]  ;;  %v282_v26 = vld [vmem:[#allocation3 + $0x68] sm:$0xff]  ;;  %v284_v27 = vld [vmem:[#allocation3 + $0x78] sm:$0xff]  ;;  %v1746_v14 = vadd.s32 128, %v233_v54  ;;  %p1522_p5 = por %p1521_p4, %p1520_p3 }
  0x2e   :  { %1216 = vmatmul.mubr.msk.f32.vlgmr.msra.gmra.mrb[0].mxu0 %vm77_vm0, %v53_v9  ;;  %1279 = vmatprep.subr.bf16.mxu1 %v1638_v17  ;;  %v1656_v28 = vpack.c.bf16 %v279_v25, %v277_v24  ;;  %v55_v29 = vld [vmem:[%s1971_s0 + $0x10] sm:$0xff]  ;;  %v1663_v30 = vpack.c.bf16 %v284_v27, %v282_v26  ;;  %v281_v31 = vld [vmem:[#allocation3 + $0x60] sm:$0xff]  ;;  %v56_v34 = vld [vmem:[%s1971_s0 + $0x18] sm:$0xff] }
  0x2f   :  { %172 = vmatprep.mubr.f32.mxu0 %v1547_v0  ;;  %1309 = vmatpush1.bf16.msra.mxu0 %v1635_v13  ;;  %v283_v32 = vld [vmem:[#allocation3 + $0x70] sm:$0xff]  ;;  %v57_v35 = vld [vmem:[%s1971_s0 + $0x20] sm:$0xff]  ;;  %v58_v36 = vld [vmem:[%s1971_s0 + $0x28] sm:$0xff]  ;;  %vm248_vm7 = vcmp.lt.s32.totalorder %v1746_v14, 160  ;;  %p1523_p6 = pnand %p1522_p5, %p1516_p2 }
  0x30   :  { %1311 = vmatprep.subr.bf16.mxu0 %v1638_v17  ;;  %v1669_v33 = vpack.c.bf16 %v283_v32, %v281_v31  ;;  %v59_v37 = vld [vmem:[%s1971_s0 + $0x30] sm:$0xff]  ;;  %v60_v38 = vld [vmem:[%s1971_s0 + $0x38] sm:$0xff]  ;;  %v65_v42 = vld [vmem:[%s1973_s2] sm:$0x3]  ;;  %s1548_s0 = smov 64  }
  0x31   :  { %1281 = vmatpush1.bf16.msra.mxu1 %v1643_v20  ;;  %v70_v44 = vrot.slane %v65_v42, %v69_v41  ;;  %v74_v45 = vrot.slane %v65_v42, %v73_v43  ;;  %vm241_vm5 = vmand %vm237_vm2, %vm239_vm3  ;;  %v1808_v54 = vld [vmem:[#allocation6] ss:$0 sm:$0xff] }
  0x32   :  { %1217 = vmatmul.mubr.msk.f32.gmra.mrb[2].mxu0 %vm77_vm0, %v54_v22  ;;  %1283 = vmatprep.subr.bf16.mxu1 %v1650_v23  ;;  %vm1729_vm6 = vmor %vm235_vm4, %vm241_vm5  ;;  %v1104_v2 = vld [vmem:[%s1976_s5] sm:$0xff] }
  0x33   :  { %178 = vmatprep.mubr.f32.mxu0 %v1547_v0  ;;  %1313 = vmatpush1.bf16.msra.mxu0 %v1643_v20 }
  0x34   :  { %1315 = vmatprep.subr.bf16.mxu0 %v1650_v23 }
  0x35   :  { %1285 = vmatpush1.bf16.msra.mxu1 %v1656_v28 }
  0x36   :  { %1218 = vmatmul.mubr.msk.f32.gmra.mrb[4].mxu0 %vm77_vm0, %v55_v29  ;;  %1287 = vmatprep.subr.bf16.mxu1 %v1663_v30 }
  0x37   :  { %184 = vmatprep.mubr.f32.mxu0 %v1547_v0  ;;  %1317 = vmatpush1.bf16.msra.mxu0 %v1656_v28 }
  0x38   :  { %1319 = vmatprep.subr.bf16.mxu0 %v1663_v30 }
  0x39   :  { %1289 = vmatpush1.bf16.msra.mxu1 %v1669_v33 }
  0x3a   :  { %1219 = vmatmul.mubr.msk.f32.gmra.mrb[6].mxu0 %vm77_vm0, %v56_v34  ;;  %1291 = vmatprep.subr.bf16.mxu1 %v1633_v10 }
  0x3b   :  { %190 = vmatprep.mubr.f32.mxu0 %v1547_v0  ;;  %1321 = vmatpush1.bf16.msra.mxu0 %v1669_v33 }
  0x3c   :  { %353 = vmatmul.mubr.f32.vlgmr.msra.gmra.mrb[0].mxu1 %v1547_v0  ;;  %1339 = vmatprep.subr.bf16.mxu0 %v1633_v10 }
  0x3d   :  { %1293 = vmatpush1.bf16.msra.mxu1 %v1635_v13  ;;  %467 = vmatprep.mubr.f32.mxu1 %v1547_v0 }
  0x3e   :  { %1220 = vmatmul.mubr.msk.f32.gmra.mrb[8].mxu0 %vm77_vm0, %v57_v35  ;;  %1295 = vmatprep.subr.bf16.mxu1 %v1638_v17 }
  0x3f   :  { %196 = vmatprep.mubr.f32.mxu0 %v1547_v0 }
  0x41   :  { %1297 = vmatpush1.bf16.msra.mxu1 %v1643_v20 }
  0x42   :  { %1221 = vmatmul.mubr.msk.f32.gmra.mrb[10].mxu0 %vm77_vm0, %v58_v36  ;;  %1299 = vmatprep.subr.bf16.mxu1 %v1650_v23 }
  0x43   :  { %202 = vmatprep.mubr.f32.mxu0 %v1547_v0 }
  0x45   :  { %1301 = vmatpush1.bf16.msra.mxu1 %v1656_v28 }
  0x46   :  { %1222 = vmatmul.mubr.msk.f32.gmra.mrb[12].mxu0 %vm77_vm0, %v59_v37  ;;  %1303 = vmatprep.subr.bf16.mxu1 %v1663_v30 }
  0x47   :  { %208 = vmatprep.mubr.f32.mxu0 %v1547_v0 }
  0x49   :  { %1305 = vmatpush1.bf16.msra.mxu1 %v1669_v33 }
  0x4a   :  { %1223 = vmatmul.mubr.msk.f32.gmra.mrb[14].mxu0 %vm77_vm0, %v60_v38  ;;  %1323 = vmatprep.subr.bf16.mxu1 %v1633_v10 }
  0x4b   :  { %575 = vmatprep.mubr.f32.mxu0 %v1547_v0 }
 0x101   :  { %v168_v46 = vpop.f32.mrb[0].mxu0 }
 0x102   :  { %v1717_v47 = vadd.f32 %v168_v46, %v70_v44  ;;  %v170_v48 = vpop.f32.mrb[1].mxu0 }
 0x103   :  { %v171_v49 = vadd.f32 %v170_v48, %v74_v45 }
 0x105   :  { %217 = vst.msk [vmem:[#allocation2 + $0x8] sm:$0xff] %vm216_vm1, %v171_v49  ;;  %v174_v50 = vpop.f32.mrb[2].mxu0 }
 0x106   :  { %v1720_v51 = vadd.f32 %v174_v50, %v70_v44  ;;  %v176_v52 = vpop.f32.mrb[3].mxu0 }
 0x107   :  { %v177_v53 = vadd.f32 %v176_v52, %v74_v45 }
 0x109   :  { %219 = vst.msk [vmem:[#allocation2 + $0x18] sm:$0xff] %vm216_vm1, %v177_v53  ;;  %v180_v55 = vpop.f32.mrb[4].mxu0 }
 0x10a   :  { %v1723_v56 = vadd.f32 %v180_v55, %v70_v44  ;;  %v182_v57 = vpop.f32.mrb[5].mxu0 }
 0x10b   :  { %v183_v58 = vadd.f32 %v182_v57, %v74_v45 }
 0x10c   :  { %v257_v48 = vld [vmem:[#allocation2 + $0x8] sm:$0xff] }
 0x10d   :  { %221 = vst.msk [vmem:[#allocation2 + $0x28] sm:$0xff] %vm216_vm1, %v183_v58  ;;  %v186_v59 = vpop.f32.mrb[6].mxu0 }
 0x10e   :  { %v1726_v60 = vadd.f32 %v186_v59, %v70_v44  ;;  %v188_v61 = vpop.f32.mrb[7].mxu0 }
 0x10f   :  { %v189_v62 = vadd.f32 %v188_v61, %v74_v45  ;;  %v354_v63 = vpop.f32.mrb[0].mxu1 }
 0x110   :  { %v356_v3 = vpop.f32.mrb[1].mxu1 }
 0x111   :  { %223 = vst.msk [vmem:[#allocation2 + $0x38] sm:$0xff] %vm216_vm1, %v189_v62  ;;  %v192_v1 = vpop.f32.mrb[8].mxu0  ;;  %v373_v55 = vadd.f32 %v1808_v54, %v356_v3 }
 0x112   :  { %v1733_v4 = vadd.f32 %v192_v1, %v70_v44  ;;  %v194_v5 = vpop.f32.mrb[9].mxu0 }
 0x113   :  { %v195_v6 = vadd.f32 %v194_v5, %v74_v45 }
 0x114   :  { %v614_v7 = vsel %vm1729_vm6, %v1726_v60, %v1733_v4  ;;  %v712_v8 = vsel %vm1729_vm6, %v1733_v4, %v1726_v60  ;;  %v1785_v38 = vld [vmem:[#allocation2 + $0x28] sm:$0xff] }
 0x115   :  { %225 = vst.msk [vmem:[#allocation2 + $0x48] sm:$0xff] %vm216_vm1, %v195_v6  ;;  %v198_v9 = vpop.f32.mrb[10].mxu0 }
 0x116   :  { %v1744_v11 = vadd.f32 %v198_v9, %v70_v44  ;;  %v200_v12 = vpop.f32.mrb[11].mxu0 }
 0x117   :  { %v201_v15 = vadd.f32 %v200_v12, %v74_v45 }
 0x118   :  { %v506_v16 = vsel %vm1729_vm6, %v1723_v56, %v1744_v11  ;;  %v810_v18 = vsel %vm1729_vm6, %v1744_v11, %v1723_v56  ;;  %v1764_v26 = vld [vmem:[#allocation2 + $0x38] sm:$0xff] }
 0x119   :  { %227 = vst.msk [vmem:[#allocation2 + $0x58] sm:$0xff] %vm216_vm1, %v201_v15  ;;  %v204_v19 = vpop.f32.mrb[12].mxu0 }
 0x11a   :  { %v1757_v21 = vadd.f32 %v204_v19, %v70_v44  ;;  %v206_v22 = vpop.f32.mrb[13].mxu0 }
 0x11b   :  { %v207_v24 = vadd.f32 %v206_v22, %v74_v45 }
 0x11c   :  { %v398_v25 = vsel %vm1729_vm6, %v1720_v51, %v1757_v21  ;;  %v1766_v27 = vld [vmem:[#allocation2 + $0x48] sm:$0xff]  ;;  %v908_v29 = vsel %vm1729_vm6, %v1757_v21, %v1720_v51 }
 0x11d   :  { %229 = vst.msk [vmem:[#allocation2 + $0x68] sm:$0xff] %vm216_vm1, %v207_v24  ;;  %v210_v31 = vpop.f32.mrb[14].mxu0  ;;  %v1777_v32 = vsel %vm248_vm7, %v1766_v27, %v1764_v26 }
 0x11e   :  { %v1779_v34 = vadd.f32 %v210_v31, %v70_v44  ;;  %v212_v35 = vpop.f32.mrb[15].mxu0  ;;  %v392_v44 = vld [vmem:[#allocation2 + $0x18] sm:$0xff] }
 0x11f   :  { %v213_v36 = vadd.f32 %v212_v35, %v74_v45 }
 0x120   :  { %v267_v37 = vsel %vm1729_vm6, %v1717_v47, %v1779_v34  ;;  %v1787_v39 = vld [vmem:[#allocation2 + $0x58] sm:$0xff]  ;;  %v1006_v40 = vsel %vm1729_vm6, %v1779_v34, %v1717_v47  ;;  %v1105_v47 = vld [vmem:[%s1976_s5 + $0x8] sm:$0xff]  ;;  %v1106_v34 = vld [vmem:[%s1976_s5 + $0x10] sm:$0xff] }
 0x121   :  { %231 = vst.msk [vmem:[#allocation2 + $0x78] sm:$0xff] %vm216_vm1, %v213_v36  ;;  %v359_v41 = vadd.f32 %v354_v63, %v267_v37  ;;  %v1798_v42 = vsel %vm248_vm7, %v1787_v39, %v1785_v38 }
 0x123   :  { %v1224_v43 = vmul.f32 -1.442695, %v359_v41 }
 0x124   :  { %v397_v45 = vld [vmem:[#allocation2 + $0x68] sm:$0xff] }
 0x125   :  { %1423 = vpow2.f32 %v1224_v43  ;;  %v1802_v46 = vsel %vm248_vm7, %v397_v45, %v392_v44  ;;  %v399_v37 = vsel %vm248_vm7, %v392_v44, %v397_v45 }
 0x128   :  { %v262_v49 = vld [vmem:[#allocation2 + $0x78] sm:$0xff] }
 0x129   :  { %v1806_v50 = vsel %vm248_vm7, %v262_v49, %v257_v48  ;;  %v268_v59 = vsel %vm248_vm7, %v257_v48, %v262_v49 }
 0x12f   :  { %v1424_v52 = vpop.eup %1423 }
 0x130   :  { %v363_v53 = vadd.f32 1.0, %v1424_v52 }
 0x132   :  { %1425 = vrcp.f32 %v363_v53 }
 0x13c   :  { %v1426_v57 = vpop.eup %1425 }
 0x13d   :  { %v374_v58 = vmul.f32 %v1426_v57, %v373_v55 }
 0x13f   :  { %v375_v61 = vadd.f32 %v374_v58, %v268_v59 }
 0x141   :  { %1427 = vtanh.f32 %v375_v61 }
 0x14b   :  { %v1428_v62 = vpop.eup %1427 }
 0x14c   :  { %v377_v63 = vsub.f32 0.0, %v1428_v62 }
 0x14e   :  { %379 = vrot.lane.b32.xlu0 %v377_v63, %s1548_s0 }
 0x1c0   :  { %v380_v1 = vpop.permute.xlu0 %379 }
 0x1c1   :  { %v382_v5 = vmul.f32 %v1426_v57, %v380_v1  ;;  %v507_v1 = vsel %vm248_vm7, %v1785_v38, %v1787_v39 }
 0x1c3   :  { %384 = vrot.lane.b32.xlu0 %v382_v5, %s1548_s0 }
 0x235   :  { %v385_v6 = vpop.permute.xlu0 %384 }
 0x236   :  { %v387_v9 = vadd.f32 %v1428_v62, %v385_v6 }
 0x238   :  { %1226 = vmatmul.mubr.msk.f32.vlgmr.msra.gmra.mrb[2].mxu1 %vm216_vm1, %v387_v9 }
 0x239   :  { %1325 = vmatpush1.bf16.msra.mxu1 %v1635_v13  ;;  %683 = vmatprep.mubr.f32.mxu1 %v1547_v0 }
 0x23a   :  { %1327 = vmatprep.subr.bf16.mxu1 %v1638_v17 }
 0x23d   :  { %1329 = vmatpush1.bf16.msra.mxu1 %v1643_v20 }
 0x23e   :  { %1331 = vmatprep.subr.bf16.mxu1 %v1650_v23 }
 0x241   :  { %1333 = vmatpush1.bf16.msra.mxu1 %v1656_v28 }
 0x242   :  { %1335 = vmatprep.subr.bf16.mxu1 %v1663_v30 }
 0x245   :  { %1337 = vmatpush1.bf16.msra.mxu1 %v1669_v33 }
 0x246   :  { %1355 = vmatprep.subr.bf16.mxu1 %v1633_v10 }
 0x30b   :  { %v469_v3 = vpop.f32.mrb[2].mxu1 }
 0x30c   :  { %v474_v12 = vadd.f32 %v469_v3, %v398_v25  ;;  %v471_v15 = vpop.f32.mrb[3].mxu1 }
 0x30d   :  { %v481_v31 = vadd.f32 %v1808_v54, %v471_v15 }
 0x30e   :  { %v1227_v19 = vmul.f32 -1.442695, %v474_v12 }
 0x310   :  { %1429 = vpow2.f32 %v1227_v19 }
 0x31a   :  { %v1430_v22 = vpop.eup %1429 }
 0x31b   :  { %v478_v24 = vadd.f32 1.0, %v1430_v22 }
 0x31d   :  { %1431 = vrcp.f32 %v478_v24 }
 0x327   :  { %v1432_v35 = vpop.eup %1431 }
 0x328   :  { %v482_v36 = vmul.f32 %v1432_v35, %v481_v31 }
 0x32a   :  { %v483_v41 = vadd.f32 %v482_v36, %v399_v37 }
 0x32c   :  { %1433 = vtanh.f32 %v483_v41 }
 0x336   :  { %v1434_v43 = vpop.eup %1433 }
 0x337   :  { %v485_v48 = vsub.f32 %v387_v9, %v1434_v43 }
 0x339   :  { %487 = vrot.lane.b32.xlu1 %v485_v48, %s1548_s0 }
 0x3ab   :  { %v488_v25 = vpop.permute.xlu1 %487 }
 0x3ac   :  { %v490_v49 = vmul.f32 %v1432_v35, %v488_v25 }
 0x3ae   :  { %492 = vrot.lane.b32.xlu1 %v490_v49, %s1548_s0 }
 0x420   :  { %v493_v52 = vpop.permute.xlu1 %492 }
 0x421   :  { %v495_v53 = vadd.f32 %v1434_v43, %v493_v52 }
 0x423   :  { %1228 = vmatmul.mubr.msk.f32.vlgmr.msra.gmra.mrb[16].mxu0 %vm216_vm1, %v495_v53 }
 0x424   :  { %1341 = vmatpush1.bf16.msra.mxu0 %v1635_v13  ;;  %781 = vmatprep.mubr.f32.mxu0 %v1547_v0 }
 0x425   :  { %1343 = vmatprep.subr.bf16.mxu0 %v1638_v17 }
 0x428   :  { %1345 = vmatpush1.bf16.msra.mxu0 %v1643_v20 }
 0x429   :  { %1347 = vmatprep.subr.bf16.mxu0 %v1650_v23 }
 0x42c   :  { %1349 = vmatpush1.bf16.msra.mxu0 %v1656_v28 }
 0x42d   :  { %1351 = vmatprep.subr.bf16.mxu0 %v1663_v30 }
 0x430   :  { %1353 = vmatpush1.bf16.msra.mxu0 %v1669_v33 }
 0x431   :  { %1371 = vmatprep.subr.bf16.mxu0 %v1633_v10 }
 0x4f6   :  { %v577_v44 = vpop.f32.mrb[16].mxu0 }
 0x4f7   :  { %v582_v45 = vadd.f32 %v577_v44, %v506_v16  ;;  %v579_v55 = vpop.f32.mrb[17].mxu0 }
 0x4f8   :  { %v589_v61 = vadd.f32 %v1808_v54, %v579_v55 }
 0x4f9   :  { %v1229_v57 = vmul.f32 -1.442695, %v582_v45 }
 0x4fb   :  { %1435 = vpow2.f32 %v1229_v57 }
 0x505   :  { %v1436_v58 = vpop.eup %1435 }
 0x506   :  { %v586_v59 = vadd.f32 1.0, %v1436_v58 }
 0x508   :  { %1437 = vrcp.f32 %v586_v59 }
 0x512   :  { %v1438_v62 = vpop.eup %1437 }
 0x513   :  { %v590_v63 = vmul.f32 %v1438_v62, %v589_v61 }
 0x515   :  { %v591_v5 = vadd.f32 %v590_v63, %v507_v1 }
 0x517   :  { %1439 = vtanh.f32 %v591_v5 }
 0x521   :  { %v1440_v6 = vpop.eup %1439 }
 0x522   :  { %v593_v9 = vsub.f32 %v495_v53, %v1440_v6 }
 0x524   :  { %595 = vrot.lane.b32.xlu0 %v593_v9, %s1548_s0 }
 0x596   :  { %v596_v16 = vpop.permute.xlu0 %595 }
 0x597   :  { %v598_v3 = vmul.f32 %v1438_v62, %v596_v16 }
 0x599   :  { %600 = vrot.lane.b32.xlu1 %v598_v3, %s1548_s0 }
 0x60b   :  { %v601_v12 = vpop.permute.xlu1 %600 }
 0x60c   :  { %v603_v15 = vadd.f32 %v1440_v6, %v601_v12 }
 0x60e   :  { %1230 = vmatmul.mubr.msk.f32.vlgmr.msra.gmra.mrb[4].mxu1 %vm216_vm1, %v603_v15 }
 0x60f   :  { %1357 = vmatpush1.bf16.msra.mxu1 %v1635_v13  ;;  %879 = vmatprep.mubr.f32.mxu1 %v1547_v0 }
 0x610   :  { %1359 = vmatprep.subr.bf16.mxu1 %v1638_v17 }
 0x613   :  { %1361 = vmatpush1.bf16.msra.mxu1 %v1643_v20 }
 0x614   :  { %1363 = vmatprep.subr.bf16.mxu1 %v1650_v23 }
 0x617   :  { %1365 = vmatpush1.bf16.msra.mxu1 %v1656_v28 }
 0x618   :  { %1367 = vmatprep.subr.bf16.mxu1 %v1663_v30 }
 0x61b   :  { %1369 = vmatpush1.bf16.msra.mxu1 %v1669_v33 }
 0x61c   :  { %1387 = vmatprep.subr.bf16.mxu1 %v1633_v10  ;;  %v615_v10 = vsel %vm248_vm7, %v1764_v26, %v1766_v27 }
 0x6e1   :  { %v685_v38 = vpop.f32.mrb[4].mxu1 }
 0x6e2   :  { %v690_v39 = vadd.f32 %v685_v38, %v614_v7  ;;  %v687_v19 = vpop.f32.mrb[5].mxu1 }
 0x6e3   :  { %v697_v35 = vadd.f32 %v1808_v54, %v687_v19 }
 0x6e4   :  { %v1231_v22 = vmul.f32 -1.442695, %v690_v39 }
 0x6e6   :  { %1441 = vpow2.f32 %v1231_v22 }
 0x6f0   :  { %v1442_v24 = vpop.eup %1441 }
 0x6f1   :  { %v694_v31 = vadd.f32 1.0, %v1442_v24 }
 0x6f3   :  { %1443 = vrcp.f32 %v694_v31 }
 0x6fd   :  { %v1444_v36 = vpop.eup %1443 }
 0x6fe   :  { %v698_v37 = vmul.f32 %v1444_v36, %v697_v35 }
 0x700   :  { %v699_v41 = vadd.f32 %v698_v37, %v615_v10 }
 0x702   :  { %1445 = vtanh.f32 %v699_v41 }
 0x70c   :  { %v1446_v43 = vpop.eup %1445 }
 0x70d   :  { %v701_v48 = vsub.f32 %v603_v15, %v1446_v43 }
 0x70f   :  { %703 = vrot.lane.b32.xlu0 %v701_v48, %s1548_s0 }
 0x781   :  { %v704_v7 = vpop.permute.xlu0 %703 }
 0x782   :  { %v706_v25 = vmul.f32 %v1444_v36, %v704_v7 }
 0x784   :  { %708 = vrot.lane.b32.xlu1 %v706_v25, %s1548_s0 }
 0x7f6   :  { %v709_v49 = vpop.permute.xlu1 %708 }
 0x7f7   :  { %v711_v52 = vadd.f32 %v1446_v43, %v709_v49 }
 0x7f9   :  { %1232 = vmatmul.mubr.msk.f32.vlgmr.msra.gmra.mrb[18].mxu0 %vm216_vm1, %v711_v52 }
 0x7fa   :  { %1373 = vmatpush1.bf16.msra.mxu0 %v1635_v13  ;;  %977 = vmatprep.mubr.f32.mxu0 %v1547_v0 }
 0x7fb   :  { %1375 = vmatprep.subr.bf16.mxu0 %v1638_v17 }
 0x7fe   :  { %1377 = vmatpush1.bf16.msra.mxu0 %v1643_v20 }
 0x7ff   :  { %1379 = vmatprep.subr.bf16.mxu0 %v1650_v23 }
 0x802   :  { %1381 = vmatpush1.bf16.msra.mxu0 %v1656_v28 }
 0x803   :  { %1383 = vmatprep.subr.bf16.mxu0 %v1663_v30 }
 0x806   :  { %1385 = vmatpush1.bf16.msra.mxu0 %v1669_v33 }
 0x8cc   :  { %v783_v14 = vpop.f32.mrb[18].mxu0 }
 0x8cd   :  { %v788_v26 = vadd.f32 %v783_v14, %v712_v8  ;;  %v785_v27 = vpop.f32.mrb[19].mxu0 }
 0x8ce   :  { %v795_v55 = vadd.f32 %v1808_v54, %v785_v27  ;;  %v1108_v27 = vld [vmem:[%s1976_s5 + $0x20] sm:$0xff] }
 0x8cf   :  { %v1233_v53 = vmul.f32 -1.442695, %v788_v26 }
 0x8d1   :  { %1447 = vpow2.f32 %v1233_v53  ;;  %v1109_v53 = vld [vmem:[%s1976_s5 + $0x28] sm:$0xff] }
 0x8db   :  { %v1448_v44 = vpop.eup %1447 }
 0x8dc   :  { %v792_v45 = vadd.f32 1.0, %v1448_v44  ;;  %v1409_v44 = vpack.c.bf16 %v1109_v53, %v1108_v27 }
 0x8de   :  { %1449 = vrcp.f32 %v792_v45 }
 0x8e8   :  { %v1450_v57 = vpop.eup %1449 }
 0x8e9   :  { %v796_v58 = vmul.f32 %v1450_v57, %v795_v55  ;;  %v1110_v55 = vld [vmem:[%s1976_s5 + $0x30] sm:$0xff] }
 0x8eb   :  { %v797_v59 = vadd.f32 %v796_v58, %v1777_v32 }
 0x8ed   :  { %1451 = vtanh.f32 %v797_v59 }
 0x8f7   :  { %v1452_v61 = vpop.eup %1451 }
 0x8f8   :  { %v799_v62 = vsub.f32 %v711_v52, %v1452_v61 }
 0x8fa   :  { %801 = vrot.lane.b32.xlu0 %v799_v62, %s1548_s0 }
 0x96c   :  { %v802_v63 = vpop.permute.xlu0 %801 }
 0x96d   :  { %v804_v60 = vmul.f32 %v1450_v57, %v802_v63  ;;  %v1111_v57 = vld [vmem:[%s1976_s5 + $0x38] sm:$0xff] }
 0x96e   :  { %v1412_v59 = vpack.c.bf16 %v1111_v57, %v1110_v55 }
 0x96f   :  { %806 = vrot.lane.b32.xlu1 %v804_v60, %s1548_s0 }
 0x9e1   :  { %v807_v4 = vpop.permute.xlu1 %806 }
 0x9e2   :  { %v809_v8 = vadd.f32 %v1452_v61, %v807_v4  ;;  %v1240_v4 = vld [vmem:[%s1977_s6] ss:$0 sm:$0xff] }
 0x9e4   :  { %1234 = vmatmul.mubr.msk.f32.vlgmr.msra.gmra.mrb[6].mxu1 %vm216_vm1, %v809_v8 }
 0x9e5   :  { %1389 = vmatpush1.bf16.msra.mxu1 %v1635_v13  ;;  %1075 = vmatprep.mubr.f32.mxu1 %v1547_v0 }
 0x9e6   :  { %1391 = vmatprep.subr.bf16.mxu1 %v1638_v17 }
 0x9e9   :  { %1393 = vmatpush1.bf16.msra.mxu1 %v1643_v20 }
 0x9ea   :  { %1395 = vmatprep.subr.bf16.mxu1 %v1650_v23 }
 0x9ed   :  { %1397 = vmatpush1.bf16.msra.mxu1 %v1656_v28 }
 0x9ee   :  { %1399 = vmatprep.subr.bf16.mxu1 %v1663_v30 }
 0x9f1   :  { %1401 = vmatpush1.bf16.msra.mxu1 %v1669_v33 }
 0xab7   :  { %v881_v32 = vpop.f32.mrb[6].mxu1 }
 0xab8   :  { %v886_v13 = vadd.f32 %v881_v32, %v810_v18  ;;  %v883_v1 = vpop.f32.mrb[7].mxu1 }
 0xab9   :  { %v893_v23 = vadd.f32 %v1808_v54, %v883_v1 }
 0xaba   :  { %v1235_v5 = vmul.f32 -1.442695, %v886_v13 }
 0xabc   :  { %1453 = vpow2.f32 %v1235_v5 }
 0xac6   :  { %v1454_v17 = vpop.eup %1453 }
 0xac7   :  { %v890_v20 = vadd.f32 1.0, %v1454_v17 }
 0xac9   :  { %1455 = vrcp.f32 %v890_v20 }
 0xad3   :  { %v1456_v28 = vpop.eup %1455 }
 0xad4   :  { %v894_v6 = vmul.f32 %v1456_v28, %v893_v23 }
 0xad6   :  { %v895_v30 = vadd.f32 %v894_v6, %v1798_v42 }
 0xad8   :  { %1457 = vtanh.f32 %v895_v30 }
 0xae2   :  { %v1458_v33 = vpop.eup %1457 }
 0xae3   :  { %v897_v9 = vsub.f32 %v809_v8, %v1458_v33 }
 0xae5   :  { %899 = vrot.lane.b32.xlu0 %v897_v9, %s1548_s0 }
 0xb57   :  { %v900_v16 = vpop.permute.xlu0 %899 }
 0xb58   :  { %v902_v56 = vmul.f32 %v1456_v28, %v900_v16 }
 0xb5a   :  { %904 = vrot.lane.b32.xlu1 %v902_v56, %s1548_s0 }
 0xbcc   :  { %v905_v11 = vpop.permute.xlu1 %904 }
 0xbcd   :  { %v907_v18 = vadd.f32 %v1458_v33, %v905_v11 }
 0xbcf   :  { %1236 = vmatmul.mubr.msk.f32.vlgmr.msra.gmra.mrb[20].mxu0 %vm216_vm1, %v907_v18 }
 0xbd0   :  { %1267 = vmatprep.mubr.msk.f32.mxu0 %vm1550_vm8, %v1547_v0 }
 0xca2   :  { %v979_v3 = vpop.f32.mrb[20].mxu0 }
 0xca3   :  { %v984_v42 = vadd.f32 %v979_v3, %v908_v29  ;;  %v981_v12 = vpop.f32.mrb[21].mxu0 }
 0xca4   :  { %v991_v19 = vadd.f32 %v1808_v54, %v981_v12 }
 0xca5   :  { %v1237_v15 = vmul.f32 -1.442695, %v984_v42 }
 0xca7   :  { %1459 = vpow2.f32 %v1237_v15 }
 0xcb1   :  { %v1460_v38 = vpop.eup %1459 }
 0xcb2   :  { %v988_v39 = vadd.f32 1.0, %v1460_v38 }
 0xcb4   :  { %1461 = vrcp.f32 %v988_v39 }
 0xcbe   :  { %v1462_v22 = vpop.eup %1461 }
 0xcbf   :  { %v992_v24 = vmul.f32 %v1462_v22, %v991_v19 }
 0xcc1   :  { %v993_v31 = vadd.f32 %v992_v24, %v1802_v46 }
 0xcc3   :  { %1463 = vtanh.f32 %v993_v31 }
 0xccd   :  { %v1464_v35 = vpop.eup %1463 }
 0xcce   :  { %v995_v36 = vsub.f32 %v907_v18, %v1464_v35 }
 0xcd0   :  { %997 = vrot.lane.b32.xlu0 %v995_v36, %s1548_s0 }
 0xd42   :  { %v998_v37 = vpop.permute.xlu0 %997 }
 0xd43   :  { %v1000_v51 = vmul.f32 %v1462_v22, %v998_v37 }
 0xd45   :  { %1002 = vrot.lane.b32.xlu1 %v1000_v51, %s1548_s0 }
 0xdb7   :  { %v1003_v21 = vpop.permute.xlu1 %1002 }
 0xdb8   :  { %v1005_v29 = vadd.f32 %v1464_v35, %v1003_v21 }
 0xdba   :  { %1238 = vmatmul.mubr.msk.f32.vlgmr.msra.gmra.mrb[8].mxu1 %vm216_vm1, %v1005_v29 }
 0xe8d   :  { %v1077_v10 = vpop.f32.mrb[8].mxu1 }
 0xe8e   :  { %v1082_v46 = vadd.f32 %v1077_v10, %v1006_v40  ;;  %v1079_v41 = vpop.f32.mrb[9].mxu1  ;;  %v1549_v40 = vmov 0.0|0.0  }
 0xe8f   :  { %v1089_v25 = vadd.f32 %v1808_v54, %v1079_v41  ;;  %1402 = vmatprep.subr.bf16.mxu0 %v1549_v40  ;;  %v1403_v54 = vpack.c.bf16 %v1105_v47, %v1104_v2 }
 0xe90   :  { %v1239_v43 = vmul.f32 -1.442695, %v1082_v46 }
 0xe91   :  { %1404 = vmatpush3.bf16.msra.mxu0 %v1403_v54 }
 0xe92   :  { %1465 = vpow2.f32 %v1239_v43  ;;  %1405 = vmatprep.subr.bf16.mxu0 %v1549_v40 }
 0xe9c   :  { %v1466_v48 = vpop.eup %1465 }
 0xe9d   :  { %v1086_v7 = vadd.f32 1.0, %v1466_v48 }
 0xe9f   :  { %1467 = vrcp.f32 %v1086_v7 }
 0xea9   :  { %v1468_v49 = vpop.eup %1467 }
 0xeaa   :  { %v1090_v52 = vmul.f32 %v1468_v49, %v1089_v25 }
 0xeac   :  { %v1091_v14 = vadd.f32 %v1090_v52, %v1806_v50  ;;  %v1107_v50 = vld [vmem:[%s1976_s5 + $0x18] sm:$0xff] }
 0xead   :  { %v1406_v26 = vpack.c.bf16 %v1107_v50, %v1106_v34 }
 0xeae   :  { %1469 = vtanh.f32 %v1091_v14 }
 0xeaf   :  { %1407 = vmatpush3.bf16.msra.mxu0 %v1406_v26 }
 0xeb0   :  { %1408 = vmatprep.subr.bf16.mxu0 %v1549_v40 }
 0xeb3   :  { %1410 = vmatpush3.bf16.msra.mxu0 %v1409_v44 }
 0xeb4   :  { %1411 = vmatprep.subr.bf16.mxu0 %v1549_v40 }
 0xeb7   :  { %1413 = vmatpush3.bf16.msra.mxu0 %v1412_v59 }
 0xeb8   :  { %v1470_v45 = vpop.eup %1469 }
 0xeb9   :  { %v1093_v58 = vsub.f32 %v1005_v29, %v1470_v45 }
 0xebb   :  { %1095 = vrot.lane.b32.xlu0 %v1093_v58, %s1548_s0 }
 0xf2d   :  { %v1096_v61 = vpop.permute.xlu0 %1095 }
 0xf2e   :  { %v1098_v62 = vmul.f32 %v1468_v49, %v1096_v61 }
 0xf30   :  { %1100 = vrot.lane.b32.xlu1 %v1098_v62, %s1548_s0 }
 0xfa2   :  { %v1101_v63 = vpop.permute.xlu1 %1100 }
 0xfa3   :  { %v1103_v60 = vadd.f32 %v1470_v45, %v1101_v63 }
 0xfa5   :  { %1268 = vmatmul.mubr.msk.f32.vlgmr.msra.gmra.mrb[22].mxu0 %vm216_vm1, %v1103_v60 }
0x1078   :  { %v1188_v8 = vpop.f32.mrb[22].mxu0 }
0x1079   :  { %v1189_v32 = vadd.f32 %v1240_v4, %v1188_v8  ;;  %v1269_v13 = vpop.f32.mrb[23].mxu0 }
0x107b   :  { %1192 = vst [vmem:[#allocation8] sm:$0xff] %v1189_v32 }
0x107c   :  { %1526 = shalt.err (!%p1523_p6)
}
0x107d   :  { %s1527_s23 = scalar_lea.hbm %s1978_s7, 128 }
0x107e   :  { %p1528_p7 = scmp.ne.s32.totalorder %s1978_s7, %s1527_s23  ;;  %p1531_p8 = scmp.lt.u32.totalorder %s1527_s23, %s1978_s7 }
0x1080   :  { %p1533_p9 = pnand %p1531_p8, %p1528_p7 }
0x1082   :  { %1536 = shalt.err (!%p1533_p9)
}
0x1083   :  { %1202 = dma.vmem_to_hbm [thread:$0]  %s1200_s19, 128, %s1978_s7, [#allocation5]  }
0x1084   :  { %1541 = dma.done.wait [#allocation5], 128  }
0x1085   :  { %1542 = vsyncadd [#allocation5], 4294967168 }
0x1086   :  { %1206 = vsyncpa [#allocation4], 1 }
0x1087   :  { %1207 = vsyncpa [#allocation7], 1 }
0x1088   :  { %1208 = vsyncpa [#allocation5], 1 }

</bundles_post_ra>
